<compile_context>
chip_gen: v7x
topology: tpu7x:2x2x1
jax: 0.10.0
libtpu: 0.0.40
codegen_flags: <defaults>
</compile_context>

<pallas_src>
import functools

import jax
import jax.numpy as jnp
from jax.experimental import pallas as pl
from jax.experimental.pallas import tpu as pltpu


def _grasp_kernel(x_ref,                        # (T*Bp, D)      f32
                  wih_f_ref, wih_b_ref,         # (D, 4H) each   f32  (gate order [i,f,o,g])
                  bf_ref, bb_ref,               # (1, 4H) each   f32  (b_ih + b_hh folded)
                  whh_f_ref, whh_b_ref,         # (H, 4H) each   bf16
                  w1t_ref, w1b_ref, b1_ref,     # (H, H), (H, H), (1, H)
                  w2_ref, b2_ref,               # (H, 128), (1, 128)  (classes padded to 128 lanes)
                  out_ref,                      # (T*Bp, 128)    f32
                  hf_ref, hb_ref,               # scratch (T*Bp, H) f32 each
                  *, T, Bp):
    H = hf_ref.shape[-1]
    H3 = 3 * H

    # ---- Hoisted input projections: one parallel matmul per direction, bias folded in.
    # These are off the recurrent critical path (kept in f32 for accuracy).
    x = x_ref[...]
    xs_f = jnp.dot(x, wih_f_ref[...], preferred_element_type=jnp.float32) + bf_ref[...]
    xs_b = jnp.dot(x, wih_b_ref[...], preferred_element_type=jnp.float32) + bb_ref[...]

    whh_f = whh_f_ref[...]
    whh_b = whh_b_ref[...]

    def gate_step(pre, c):
        # gate order [i, f, o, g]: one sigmoid over 3H contiguous lanes, one tanh over H.
        s = jax.nn.sigmoid(pre[:, :H3])
        g = jnp.tanh(pre[:, H3:])
        c_new = s[:, H:2 * H] * c + s[:, :H] * g          # f*c + i*g
        h_new = s[:, 2 * H:H3] * jnp.tanh(c_new)          # o*tanh(c)
        return h_new, c_new

    hf = jnp.zeros((Bp, H), jnp.float32)
    cf = jnp.zeros((Bp, H), jnp.float32)
    hb = jnp.zeros((Bp, H), jnp.float32)
    cb = jnp.zeros((Bp, H), jnp.float32)

    # ---- Fully-unrolled, interleaved fwd/bwd recurrence (T is small & static).
    # Only h @ W_hh (bf16 in, f32 acc) remains on the serial dependency chain.
    for t in range(T):
        tb = T - 1 - t
        pre_f = xs_f[t * Bp:(t + 1) * Bp, :] + jnp.dot(
            hf.astype(whh_f.dtype), whh_f, preferred_element_type=jnp.float32)
        pre_b = xs_b[tb * Bp:(tb + 1) * Bp, :] + jnp.dot(
            hb.astype(whh_b.dtype), whh_b, preferred_element_type=jnp.float32)
        hf, cf = gate_step(pre_f, cf)
        hb, cb = gate_step(pre_b, cb)
        hf_ref[t * Bp:(t + 1) * Bp, :] = hf        # static, sublane-aligned stores
        hb_ref[tb * Bp:(tb + 1) * Bp, :] = hb

    # ---- Classifier: Linear(2H,H) as two summed matmuls (no concat / no reshape)
    #      -> ReLU -> (Dropout: identity) -> Linear(H, 4) padded to a lane-dense 128 output.
    z1 = (jnp.dot(hf_ref[...], w1t_ref[...], preferred_element_type=jnp.float32)
          + jnp.dot(hb_ref[...], w1b_ref[...], preferred_element_type=jnp.float32)
          + b1_ref[...])
    z1 = jnp.maximum(z1, 0.0)
    out_ref[...] = jnp.dot(z1, w2_ref[...], preferred_element_type=jnp.float32) + b2_ref[...]


def grasp_phase_detector(x_btd, params):
    """x_btd: (B, T, D) float32 -> (B, T, 4) float32."""
    B, T, D = x_btd.shape
    H = params["whh_f"].shape[0]
    BP = max(8, -(-B // 8) * 8)          # pad batch to the f32 sublane tile
    C = params["w2"].shape[1]            # 4 classes
    CP = 128                             # lane-dense output width

    def reorder(w):  # permute gate columns [i, f, g, o] -> [i, f, o, g]
        return jnp.concatenate([w[..., :2 * H], w[..., 3 * H:], w[..., 2 * H:3 * H]],
                               axis=-1)

    # Layout plumbing (one-time, wrapper-side): time-major, batch-pad, flatten to 2-D.
    x_tbd = jnp.transpose(x_btd, (1, 0, 2))                    # (T, B, D)
    x_pad = jnp.pad(x_tbd, ((0, 0), (0, BP - B), (0, 0)))      # (T, BP, D)
    x2d = x_pad.reshape(T * BP, D)

    wih_f = reorder(params["wih_f"])
    wih_b = reorder(params["wih_b"])
    b_f = reorder(params["b_f"])
    b_b = reorder(params["b_b"])
    whh_f = reorder(params["whh_f"]).astype(jnp.bfloat16)      # recurrent weights -> bf16
    whh_b = reorder(params["whh_b"]).astype(jnp.bfloat16)

    w1t = params["w1"][:H, :]                                  # split Linear(2H, H)
    w1b = params["w1"][H:, :]
    w2p = jnp.pad(params["w2"], ((0, 0), (0, CP - C)))         # pad classes to 128 lanes
    b2p = jnp.pad(params["b2"], ((0, 0), (0, CP - C)))

    vmem = pl.BlockSpec(memory_space=pltpu.MemorySpace.VMEM)
    out2d = pl.pallas_call(
        functools.partial(_grasp_kernel, T=T, Bp=BP),
        out_shape=jax.ShapeDtypeStruct((T * BP, CP), jnp.float32),
        in_specs=[vmem] * 12,
        out_specs=vmem,
        scratch_shapes=[
            pltpu.VMEM((T * BP, H), jnp.float32),
            pltpu.VMEM((T * BP, H), jnp.float32),
        ],
    )(x2d, wih_f, wih_b, b_f, b_b, whh_f, whh_b,
      w1t, w1b, params["b1"], w2p, b2p)

    out = out2d.reshape(T, BP, CP)[:, :B, :C]                  # (T, B, 4)
    return jnp.transpose(out, (1, 0, 2))                       # (B, T, 4)


def init_params(key, input_dim, hidden_dim):
    """Deterministic PyTorch-style uniform(-1/sqrt(H), 1/sqrt(H)) init."""
    H, D = hidden_dim, input_dim
    k = 1.0 / jnp.sqrt(jnp.float32(H))
    keys = jax.random.split(key, 12)

    def u(kk, shape, scale):
        return jax.random.uniform(kk, shape, jnp.float32, -scale, scale)

    # LSTM: b = b_ih + b_hh folded into a single bias per direction (gate order [i,f,g,o]).
    params = {
        "wih_f": u(keys[0], (D, 4 * H), k),
        "whh_f": u(keys[1], (H, 4 * H), k),
        "b_f":   u(keys[2], (1, 4 * H), k) + u(keys[3], (1, 4 * H), k),
        "wih_b": u(keys[4], (D, 4 * H), k),
        "whh_b": u(keys[5], (H, 4 * H), k),
        "b_b":   u(keys[6], (1, 4 * H), k) + u(keys[7], (1, 4 * H), k),
        # classifier
        "w1": u(keys[8], (2 * H, H), 1.0 / jnp.sqrt(jnp.float32(2 * H))),
        "b1": u(keys[9], (1, H), 1.0 / jnp.sqrt(jnp.float32(2 * H))),
        "w2": u(keys[10], (H, 4), k),
        "b2": u(keys[11], (1, 4), k),
    }
    return params


def reference_forward(x, p):
    """Pure-JAX f32 reference (mirrors PyTorch bi-LSTM + classifier, eval mode)."""
    B, T, D = x.shape
    H = p["whh_f"].shape[0]

    def run_dir(wih, whh, b, reverse):
        h = jnp.zeros((B, H), jnp.float32)
        c = jnp.zeros((B, H), jnp.float32)
        outs = [None] * T
        ts = range(T - 1, -1, -1) if reverse else range(T)
        for t in ts:
            gates = x[:, t, :] @ wih + h @ whh + b
            i = jax.nn.sigmoid(gates[:, 0 * H:1 * H])
            f = jax.nn.sigmoid(gates[:, 1 * H:2 * H])
            g = jnp.tanh(gates[:, 2 * H:3 * H])
            o = jax.nn.sigmoid(gates[:, 3 * H:4 * H])
            c = f * c + i * g
            h = o * jnp.tanh(c)
            outs[t] = h
        return jnp.stack(outs, axis=1)  # (B, T, H)

    hf = run_dir(p["wih_f"], p["whh_f"], p["b_f"], False)
    hb = run_dir(p["wih_b"], p["whh_b"], p["b_b"], True)
    hcat = jnp.concatenate([hf, hb], axis=-1)
    z1 = jnp.maximum(hcat @ p["w1"] + p["b1"], 0.0)
    return z1 @ p["w2"] + p["b2"]


if __name__ == "__main__":
    B, T = 2, 8
    INPUT_DIM, HIDDEN_DIM = 16, 32   # GraspPhaseDetector(input_dim=16, hidden_dim=32)

    key = jax.random.PRNGKey(0)
    kx, kp = jax.random.split(key)
    x = jax.random.normal(kx, (B, T, INPUT_DIM), jnp.float32)
    params = init_params(kp, INPUT_DIM, HIDDEN_DIM)

    out = jax.jit(grasp_phase_detector)(x, params)
    out = jax.block_until_ready(out)
    assert out.shape == (B, T, 4) and out.dtype == jnp.float32

    ref = reference_forward(x, params)
    # 2e-2 tolerance: recurrent h @ W_hh runs with bf16 inputs (f32 accumulation).
    err = jnp.max(jnp.abs(out - ref))
    assert err < 2e-2, f"kernel does not match reference (max abs err {err})"

    print("KERNEL_OK")
</pallas_src>

<mosaic_0001>
module attributes {stable_mosaic.version = 11 : i64} {
  func.func @_grasp_kernel(%arg0: memref<64x16xf32, #tpu.memory_space<vmem>>, %arg1: memref<16x128xf32, #tpu.memory_space<vmem>>, %arg2: memref<16x128xf32, #tpu.memory_space<vmem>>, %arg3: memref<1x128xf32, #tpu.memory_space<vmem>>, %arg4: memref<1x128xf32, #tpu.memory_space<vmem>>, %arg5: memref<32x128xbf16, #tpu.memory_space<vmem>>, %arg6: memref<32x128xbf16, #tpu.memory_space<vmem>>, %arg7: memref<32x32xf32, #tpu.memory_space<vmem>>, %arg8: memref<32x32xf32, #tpu.memory_space<vmem>>, %arg9: memref<1x32xf32, #tpu.memory_space<vmem>>, %arg10: memref<32x128xf32, #tpu.memory_space<vmem>>, %arg11: memref<1x128xf32, #tpu.memory_space<vmem>>, %arg12: memref<64x128xf32, #tpu.memory_space<vmem>>, %arg13: memref<64x32xf32, #tpu.memory_space<vmem>>, %arg14: memref<64x32xf32, #tpu.memory_space<vmem>>) attributes {dimension_semantics = [], scalar_prefetch = 0 : i64, scratch_operands = 2 : i64, tpu.core_type = #tpu.core_type<tc>} {
    %c0 = arith.constant 0 : index
    %c0_0 = arith.constant 0 : index
    %0 = vector.load %arg0[%c0, %c0_0] : memref<64x16xf32, #tpu.memory_space<vmem>>, vector<64x16xf32>
    %c0_1 = arith.constant 0 : index
    %c0_2 = arith.constant 0 : index
    %1 = vector.load %arg1[%c0_1, %c0_2] : memref<16x128xf32, #tpu.memory_space<vmem>>, vector<16x128xf32>
    %cst = arith.constant dense<0.000000e+00> : vector<64x128xf32>
    %2 = tpu.matmul %0, %1, %cst {dimension_numbers = #tpu.dot_dimension_numbers<[1], [0], [0], [1], [0, 0, 1, 1], [], []>} : vector<64x16xf32>, vector<16x128xf32>, vector<64x128xf32> -> vector<64x128xf32>
    %c0_3 = arith.constant 0 : index
    %c0_4 = arith.constant 0 : index
    %3 = vector.load %arg3[%c0_3, %c0_4] : memref<1x128xf32, #tpu.memory_space<vmem>>, vector<1x128xf32>
    %4 = vector.broadcast %3 : vector<1x128xf32> to vector<64x128xf32>
    %5 = arith.addf %2, %4 : vector<64x128xf32>
    %c0_5 = arith.constant 0 : index
    %c0_6 = arith.constant 0 : index
    %6 = vector.load %arg2[%c0_5, %c0_6] : memref<16x128xf32, #tpu.memory_space<vmem>>, vector<16x128xf32>
    %cst_7 = arith.constant dense<0.000000e+00> : vector<64x128xf32>
    %7 = tpu.matmul %0, %6, %cst_7 {dimension_numbers = #tpu.dot_dimension_numbers<[1], [0], [0], [1], [0, 0, 1, 1], [], []>} : vector<64x16xf32>, vector<16x128xf32>, vector<64x128xf32> -> vector<64x128xf32>
    %c0_8 = arith.constant 0 : index
    %c0_9 = arith.constant 0 : index
    %8 = vector.load %arg4[%c0_8, %c0_9] : memref<1x128xf32, #tpu.memory_space<vmem>>, vector<1x128xf32>
    %9 = vector.broadcast %8 : vector<1x128xf32> to vector<64x128xf32>
    %10 = arith.addf %7, %9 : vector<64x128xf32>
    %c0_10 = arith.constant 0 : index
    %c0_11 = arith.constant 0 : index
    %11 = vector.load %arg5[%c0_10, %c0_11] : memref<32x128xbf16, #tpu.memory_space<vmem>>, vector<32x128xbf16>
    %c0_12 = arith.constant 0 : index
    %c0_13 = arith.constant 0 : index
    %12 = vector.load %arg6[%c0_12, %c0_13] : memref<32x128xbf16, #tpu.memory_space<vmem>>, vector<32x128xbf16>
    %cst_14 = arith.constant 0.000000e+00 : f32
    %13 = vector.broadcast %cst_14 : f32 to vector<8x32xf32>
    %cst_15 = arith.constant 0.000000e+00 : f32
    %14 = vector.broadcast %cst_15 : f32 to vector<8x32xf32>
    %cst_16 = arith.constant 0.000000e+00 : f32
    %15 = vector.broadcast %cst_16 : f32 to vector<8x32xf32>
    %cst_17 = arith.constant 0.000000e+00 : f32
    %16 = vector.broadcast %cst_17 : f32 to vector<8x32xf32>
    %17 = vector.extract_strided_slice %5 {offsets = [0, 0], sizes = [8, 128], strides = [1, 1]} : vector<64x128xf32> to vector<8x128xf32>
    %18 = arith.truncf %13 : vector<8x32xf32> to vector<8x32xbf16>
    %cst_18 = arith.constant dense<0.000000e+00> : vector<8x128xf32>
    %19 = tpu.matmul %18, %11, %cst_18 {dimension_numbers = #tpu.dot_dimension_numbers<[1], [0], [0], [1], [0, 0, 1, 1], [], []>} : vector<8x32xbf16>, vector<32x128xbf16>, vector<8x128xf32> -> vector<8x128xf32>
    %20 = arith.addf %17, %19 : vector<8x128xf32>
    %21 = vector.extract_strided_slice %10 {offsets = [56, 0], sizes = [8, 128], strides = [1, 1]} : vector<64x128xf32> to vector<8x128xf32>
    %22 = arith.truncf %15 : vector<8x32xf32> to vector<8x32xbf16>
    %cst_19 = arith.constant dense<0.000000e+00> : vector<8x128xf32>
    %23 = tpu.matmul %22, %12, %cst_19 {dimension_numbers = #tpu.dot_dimension_numbers<[1], [0], [0], [1], [0, 0, 1, 1], [], []>} : vector<8x32xbf16>, vector<32x128xbf16>, vector<8x128xf32> -> vector<8x128xf32>
    %24 = arith.addf %21, %23 : vector<8x128xf32>
    %25 = vector.extract_strided_slice %20 {offsets = [0, 0], sizes = [8, 96], strides = [1, 1]} : vector<8x128xf32> to vector<8x96xf32>
    %26 = arith.negf %25 : vector<8x96xf32>
    %27 = math.exp %26 : vector<8x96xf32>
    %cst_20 = arith.constant 1.000000e+00 : f32
    %28 = vector.broadcast %cst_20 : f32 to vector<8x96xf32>
    %29 = arith.addf %28, %27 : vector<8x96xf32>
    %30 = arith.divf %28, %29 : vector<8x96xf32>
    %31 = vector.extract_strided_slice %20 {offsets = [0, 96], sizes = [8, 32], strides = [1, 1]} : vector<8x128xf32> to vector<8x32xf32>
    %32 = math.tanh %31 : vector<8x32xf32>
    %33 = vector.extract_strided_slice %30 {offsets = [0, 32], sizes = [8, 32], strides = [1, 1]} : vector<8x96xf32> to vector<8x32xf32>
    %34 = arith.mulf %33, %14 : vector<8x32xf32>
    %35 = vector.extract_strided_slice %30 {offsets = [0, 0], sizes = [8, 32], strides = [1, 1]} : vector<8x96xf32> to vector<8x32xf32>
    %36 = arith.mulf %35, %32 : vector<8x32xf32>
    %37 = arith.addf %34, %36 : vector<8x32xf32>
    %38 = vector.extract_strided_slice %30 {offsets = [0, 64], sizes = [8, 32], strides = [1, 1]} : vector<8x96xf32> to vector<8x32xf32>
    %39 = math.tanh %37 : vector<8x32xf32>
    %40 = arith.mulf %38, %39 : vector<8x32xf32>
    %41 = vector.extract_strided_slice %24 {offsets = [0, 0], sizes = [8, 96], strides = [1, 1]} : vector<8x128xf32> to vector<8x96xf32>
    %42 = arith.negf %41 : vector<8x96xf32>
    %43 = math.exp %42 : vector<8x96xf32>
    %cst_21 = arith.constant 1.000000e+00 : f32
    %44 = vector.broadcast %cst_21 : f32 to vector<8x96xf32>
    %45 = arith.addf %44, %43 : vector<8x96xf32>
    %46 = arith.divf %44, %45 : vector<8x96xf32>
    %47 = vector.extract_strided_slice %24 {offsets = [0, 96], sizes = [8, 32], strides = [1, 1]} : vector<8x128xf32> to vector<8x32xf32>
    %48 = math.tanh %47 : vector<8x32xf32>
    %49 = vector.extract_strided_slice %46 {offsets = [0, 32], sizes = [8, 32], strides = [1, 1]} : vector<8x96xf32> to vector<8x32xf32>
    %50 = arith.mulf %49, %16 : vector<8x32xf32>
    %51 = vector.extract_strided_slice %46 {offsets = [0, 0], sizes = [8, 32], strides = [1, 1]} : vector<8x96xf32> to vector<8x32xf32>
    %52 = arith.mulf %51, %48 : vector<8x32xf32>
    %53 = arith.addf %50, %52 : vector<8x32xf32>
    %54 = vector.extract_strided_slice %46 {offsets = [0, 64], sizes = [8, 32], strides = [1, 1]} : vector<8x96xf32> to vector<8x32xf32>
    %55 = math.tanh %53 : vector<8x32xf32>
    %56 = arith.mulf %54, %55 : vector<8x32xf32>
    %c0_22 = arith.constant 0 : index
    %c0_23 = arith.constant 0 : index
    %57 = vector.load %arg13[%c0_22, %c0_23] : memref<64x32xf32, #tpu.memory_space<vmem>>, vector<8x32xf32>
    tpu.vector_store %arg13[%c0_22, %c0_23], %40 {strides = array<i32>} : memref<64x32xf32, #tpu.memory_space<vmem>>, vector<8x32xf32>,
    %c56 = arith.constant 56 : index
    %c0_24 = arith.constant 0 : index
    %58 = vector.load %arg14[%c56, %c0_24] : memref<64x32xf32, #tpu.memory_space<vmem>>, vector<8x32xf32>
    tpu.vector_store %arg14[%c56, %c0_24], %56 {strides = array<i32>} : memref<64x32xf32, #tpu.memory_space<vmem>>, vector<8x32xf32>,
    %59 = vector.extract_strided_slice %5 {offsets = [8, 0], sizes = [8, 128], strides = [1, 1]} : vector<64x128xf32> to vector<8x128xf32>
    %60 = arith.truncf %40 : vector<8x32xf32> to vector<8x32xbf16>
    %cst_25 = arith.constant dense<0.000000e+00> : vector<8x128xf32>
    %61 = tpu.matmul %60, %11, %cst_25 {dimension_numbers = #tpu.dot_dimension_numbers<[1], [0], [0], [1], [0, 0, 1, 1], [], []>} : vector<8x32xbf16>, vector<32x128xbf16>, vector<8x128xf32> -> vector<8x128xf32>
    %62 = arith.addf %59, %61 : vector<8x128xf32>
    %63 = vector.extract_strided_slice %10 {offsets = [48, 0], sizes = [8, 128], strides = [1, 1]} : vector<64x128xf32> to vector<8x128xf32>
    %64 = arith.truncf %56 : vector<8x32xf32> to vector<8x32xbf16>
    %cst_26 = arith.constant dense<0.000000e+00> : vector<8x128xf32>
    %65 = tpu.matmul %64, %12, %cst_26 {dimension_numbers = #tpu.dot_dimension_numbers<[1], [0], [0], [1], [0, 0, 1, 1], [], []>} : vector<8x32xbf16>, vector<32x128xbf16>, vector<8x128xf32> -> vector<8x128xf32>
    %66 = arith.addf %63, %65 : vector<8x128xf32>
    %67 = vector.extract_strided_slice %62 {offsets = [0, 0], sizes = [8, 96], strides = [1, 1]} : vector<8x128xf32> to vector<8x96xf32>
    %68 = arith.negf %67 : vector<8x96xf32>
    %69 = math.exp %68 : vector<8x96xf32>
    %cst_27 = arith.constant 1.000000e+00 : f32
    %70 = vector.broadcast %cst_27 : f32 to vector<8x96xf32>
    %71 = arith.addf %70, %69 : vector<8x96xf32>
    %72 = arith.divf %70, %71 : vector<8x96xf32>
    %73 = vector.extract_strided_slice %62 {offsets = [0, 96], sizes = [8, 32], strides = [1, 1]} : vector<8x128xf32> to vector<8x32xf32>
    %74 = math.tanh %73 : vector<8x32xf32>
    %75 = vector.extract_strided_slice %72 {offsets = [0, 32], sizes = [8, 32], strides = [1, 1]} : vector<8x96xf32> to vector<8x32xf32>
    %76 = arith.mulf %75, %37 : vector<8x32xf32>
    %77 = vector.extract_strided_slice %72 {offsets = [0, 0], sizes = [8, 32], strides = [1, 1]} : vector<8x96xf32> to vector<8x32xf32>
    %78 = arith.mulf %77, %74 : vector<8x32xf32>
    %79 = arith.addf %76, %78 : vector<8x32xf32>
    %80 = vector.extract_strided_slice %72 {offsets = [0, 64], sizes = [8, 32], strides = [1, 1]} : vector<8x96xf32> to vector<8x32xf32>
    %81 = math.tanh %79 : vector<8x32xf32>
    %82 = arith.mulf %80, %81 : vector<8x32xf32>
    %83 = vector.extract_strided_slice %66 {offsets = [0, 0], sizes = [8, 96], strides = [1, 1]} : vector<8x128xf32> to vector<8x96xf32>
    %84 = arith.negf %83 : vector<8x96xf32>
    %85 = math.exp %84 : vector<8x96xf32>
    %cst_28 = arith.constant 1.000000e+00 : f32
    %86 = vector.broadcast %cst_28 : f32 to vector<8x96xf32>
    %87 = arith.addf %86, %85 : vector<8x96xf32>
    %88 = arith.divf %86, %87 : vector<8x96xf32>
    %89 = vector.extract_strided_slice %66 {offsets = [0, 96], sizes = [8, 32], strides = [1, 1]} : vector<8x128xf32> to vector<8x32xf32>
    %90 = math.tanh %89 : vector<8x32xf32>
    %91 = vector.extract_strided_slice %88 {offsets = [0, 32], sizes = [8, 32], strides = [1, 1]} : vector<8x96xf32> to vector<8x32xf32>
    %92 = arith.mulf %91, %53 : vector<8x32xf32>
    %93 = vector.extract_strided_slice %88 {offsets = [0, 0], sizes = [8, 32], strides = [1, 1]} : vector<8x96xf32> to vector<8x32xf32>
    %94 = arith.mulf %93, %90 : vector<8x32xf32>
    %95 = arith.addf %92, %94 : vector<8x32xf32>
    %96 = vector.extract_strided_slice %88 {offsets = [0, 64], sizes = [8, 32], strides = [1, 1]} : vector<8x96xf32> to vector<8x32xf32>
    %97 = math.tanh %95 : vector<8x32xf32>
    %98 = arith.mulf %96, %97 : vector<8x32xf32>
    %c8 = arith.constant 8 : index
    %c0_29 = arith.constant 0 : index
    %99 = vector.load %arg13[%c8, %c0_29] : memref<64x32xf32, #tpu.memory_space<vmem>>, vector<8x32xf32>
    tpu.vector_store %arg13[%c8, %c0_29], %82 {strides = array<i32>} : memref<64x32xf32, #tpu.memory_space<vmem>>, vector<8x32xf32>,
    %c48 = arith.constant 48 : index
    %c0_30 = arith.constant 0 : index
    %100 = vector.load %arg14[%c48, %c0_30] : memref<64x32xf32, #tpu.memory_space<vmem>>, vector<8x32xf32>
    tpu.vector_store %arg14[%c48, %c0_30], %98 {strides = array<i32>} : memref<64x32xf32, #tpu.memory_space<vmem>>, vector<8x32xf32>,
    %101 = vector.extract_strided_slice %5 {offsets = [16, 0], sizes = [8, 128], strides = [1, 1]} : vector<64x128xf32> to vector<8x128xf32>
    %102 = arith.truncf %82 : vector<8x32xf32> to vector<8x32xbf16>
    %cst_31 = arith.constant dense<0.000000e+00> : vector<8x128xf32>
    %103 = tpu.matmul %102, %11, %cst_31 {dimension_numbers = #tpu.dot_dimension_numbers<[1], [0], [0], [1], [0, 0, 1, 1], [], []>} : vector<8x32xbf16>, vector<32x128xbf16>, vector<8x128xf32> -> vector<8x128xf32>
    %104 = arith.addf %101, %103 : vector<8x128xf32>
    %105 = vector.extract_strided_slice %10 {offsets = [40, 0], sizes = [8, 128], strides = [1, 1]} : vector<64x128xf32> to vector<8x128xf32>
    %106 = arith.truncf %98 : vector<8x32xf32> to vector<8x32xbf16>
    %cst_32 = arith.constant dense<0.000000e+00> : vector<8x128xf32>
    %107 = tpu.matmul %106, %12, %cst_32 {dimension_numbers = #tpu.dot_dimension_numbers<[1], [0], [0], [1], [0, 0, 1, 1], [], []>} : vector<8x32xbf16>, vector<32x128xbf16>, vector<8x128xf32> -> vector<8x128xf32>
    %108 = arith.addf %105, %107 : vector<8x128xf32>
    %109 = vector.extract_strided_slice %104 {offsets = [0, 0], sizes = [8, 96], strides = [1, 1]} : vector<8x128xf32> to vector<8x96xf32>
    %110 = arith.negf %109 : vector<8x96xf32>
    %111 = math.exp %110 : vector<8x96xf32>
    %cst_33 = arith.constant 1.000000e+00 : f32
    %112 = vector.broadcast %cst_33 : f32 to vector<8x96xf32>
    %113 = arith.addf %112, %111 : vector<8x96xf32>
    %114 = arith.divf %112, %113 : vector<8x96xf32>
    %115 = vector.extract_strided_slice %104 {offsets = [0, 96], sizes = [8, 32], strides = [1, 1]} : vector<8x128xf32> to vector<8x32xf32>
    %116 = math.tanh %115 : vector<8x32xf32>
    %117 = vector.extract_strided_slice %114 {offsets = [0, 32], sizes = [8, 32], strides = [1, 1]} : vector<8x96xf32> to vector<8x32xf32>
    %118 = arith.mulf %117, %79 : vector<8x32xf32>
    %119 = vector.extract_strided_slice %114 {offsets = [0, 0], sizes = [8, 32], strides = [1, 1]} : vector<8x96xf32> to vector<8x32xf32>
    %120 = arith.mulf %119, %116 : vector<8x32xf32>
    %121 = arith.addf %118, %120 : vector<8x32xf32>
    %122 = vector.extract_strided_slice %114 {offsets = [0, 64], sizes = [8, 32], strides = [1, 1]} : vector<8x96xf32> to vector<8x32xf32>
    %123 = math.tanh %121 : vector<8x32xf32>
    %124 = arith.mulf %122, %123 : vector<8x32xf32>
    %125 = vector.extract_strided_slice %108 {offsets = [0, 0], sizes = [8, 96], strides = [1, 1]} : vector<8x128xf32> to vector<8x96xf32>
    %126 = arith.negf %125 : vector<8x96xf32>
    %127 = math.exp %126 : vector<8x96xf32>
    %cst_34 = arith.constant 1.000000e+00 : f32
    %128 = vector.broadcast %cst_34 : f32 to vector<8x96xf32>
    %129 = arith.addf %128, %127 : vector<8x96xf32>
    %130 = arith.divf %128, %129 : vector<8x96xf32>
    %131 = vector.extract_strided_slice %108 {offsets = [0, 96], sizes = [8, 32], strides = [1, 1]} : vector<8x128xf32> to vector<8x32xf32>
    %132 = math.tanh %131 : vector<8x32xf32>
    %133 = vector.extract_strided_slice %130 {offsets = [0, 32], sizes = [8, 32], strides = [1, 1]} : vector<8x96xf32> to vector<8x32xf32>
    %134 = arith.mulf %133, %95 : vector<8x32xf32>
    %135 = vector.extract_strided_slice %130 {offsets = [0, 0], sizes = [8, 32], strides = [1, 1]} : vector<8x96xf32> to vector<8x32xf32>
    %136 = arith.mulf %135, %132 : vector<8x32xf32>
    %137 = arith.addf %134, %136 : vector<8x32xf32>
    %138 = vector.extract_strided_slice %130 {offsets = [0, 64], sizes = [8, 32], strides = [1, 1]} : vector<8x96xf32> to vector<8x32xf32>
    %139 = math.tanh %137 : vector<8x32xf32>
    %140 = arith.mulf %138, %139 : vector<8x32xf32>
    %c16 = arith.constant 16 : index
    %c0_35 = arith.constant 0 : index
    %141 = vector.load %arg13[%c16, %c0_35] : memref<64x32xf32, #tpu.memory_space<vmem>>, vector<8x32xf32>
    tpu.vector_store %arg13[%c16, %c0_35], %124 {strides = array<i32>} : memref<64x32xf32, #tpu.memory_space<vmem>>, vector<8x32xf32>,
    %c40 = arith.constant 40 : index
    %c0_36 = arith.constant 0 : index
    %142 = vector.load %arg14[%c40, %c0_36] : memref<64x32xf32, #tpu.memory_space<vmem>>, vector<8x32xf32>
    tpu.vector_store %arg14[%c40, %c0_36], %140 {strides = array<i32>} : memref<64x32xf32, #tpu.memory_space<vmem>>, vector<8x32xf32>,
    %143 = vector.extract_strided_slice %5 {offsets = [24, 0], sizes = [8, 128], strides = [1, 1]} : vector<64x128xf32> to vector<8x128xf32>
    %144 = arith.truncf %124 : vector<8x32xf32> to vector<8x32xbf16>
    %cst_37 = arith.constant dense<0.000000e+00> : vector<8x128xf32>
    %145 = tpu.matmul %144, %11, %cst_37 {dimension_numbers = #tpu.dot_dimension_numbers<[1], [0], [0], [1], [0, 0, 1, 1], [], []>} : vector<8x32xbf16>, vector<32x128xbf16>, vector<8x128xf32> -> vector<8x128xf32>
    %146 = arith.addf %143, %145 : vector<8x128xf32>
    %147 = vector.extract_strided_slice %10 {offsets = [32, 0], sizes = [8, 128], strides = [1, 1]} : vector<64x128xf32> to vector<8x128xf32>
    %148 = arith.truncf %140 : vector<8x32xf32> to vector<8x32xbf16>
    %cst_38 = arith.constant dense<0.000000e+00> : vector<8x128xf32>
    %149 = tpu.matmul %148, %12, %cst_38 {dimension_numbers = #tpu.dot_dimension_numbers<[1], [0], [0], [1], [0, 0, 1, 1], [], []>} : vector<8x32xbf16>, vector<32x128xbf16>, vector<8x128xf32> -> vector<8x128xf32>
    %150 = arith.addf %147, %149 : vector<8x128xf32>
    %151 = vector.extract_strided_slice %146 {offsets = [0, 0], sizes = [8, 96], strides = [1, 1]} : vector<8x128xf32> to vector<8x96xf32>
    %152 = arith.negf %151 : vector<8x96xf32>
    %153 = math.exp %152 : vector<8x96xf32>
    %cst_39 = arith.constant 1.000000e+00 : f32
    %154 = vector.broadcast %cst_39 : f32 to vector<8x96xf32>
    %155 = arith.addf %154, %153 : vector<8x96xf32>
    %156 = arith.divf %154, %155 : vector<8x96xf32>
    %157 = vector.extract_strided_slice %146 {offsets = [0, 96], sizes = [8, 32], strides = [1, 1]} : vector<8x128xf32> to vector<8x32xf32>
    %158 = math.tanh %157 : vector<8x32xf32>
    %159 = vector.extract_strided_slice %156 {offsets = [0, 32], sizes = [8, 32], strides = [1, 1]} : vector<8x96xf32> to vector<8x32xf32>
    %160 = arith.mulf %159, %121 : vector<8x32xf32>
    %161 = vector.extract_strided_slice %156 {offsets = [0, 0], sizes = [8, 32], strides = [1, 1]} : vector<8x96xf32> to vector<8x32xf32>
    %162 = arith.mulf %161, %158 : vector<8x32xf32>
    %163 = arith.addf %160, %162 : vector<8x32xf32>
    %164 = vector.extract_strided_slice %156 {offsets = [0, 64], sizes = [8, 32], strides = [1, 1]} : vector<8x96xf32> to vector<8x32xf32>
    %165 = math.tanh %163 : vector<8x32xf32>
    %166 = arith.mulf %164, %165 : vector<8x32xf32>
    %167 = vector.extract_strided_slice %150 {offsets = [0, 0], sizes = [8, 96], strides = [1, 1]} : vector<8x128xf32> to vector<8x96xf32>
    %168 = arith.negf %167 : vector<8x96xf32>
    %169 = math.exp %168 : vector<8x96xf32>
    %cst_40 = arith.constant 1.000000e+00 : f32
    %170 = vector.broadcast %cst_40 : f32 to vector<8x96xf32>
    %171 = arith.addf %170, %169 : vector<8x96xf32>
    %172 = arith.divf %170, %171 : vector<8x96xf32>
    %173 = vector.extract_strided_slice %150 {offsets = [0, 96], sizes = [8, 32], strides = [1, 1]} : vector<8x128xf32> to vector<8x32xf32>
    %174 = math.tanh %173 : vector<8x32xf32>
    %175 = vector.extract_strided_slice %172 {offsets = [0, 32], sizes = [8, 32], strides = [1, 1]} : vector<8x96xf32> to vector<8x32xf32>
    %176 = arith.mulf %175, %137 : vector<8x32xf32>
    %177 = vector.extract_strided_slice %172 {offsets = [0, 0], sizes = [8, 32], strides = [1, 1]} : vector<8x96xf32> to vector<8x32xf32>
    %178 = arith.mulf %177, %174 : vector<8x32xf32>
    %179 = arith.addf %176, %178 : vector<8x32xf32>
    %180 = vector.extract_strided_slice %172 {offsets = [0, 64], sizes = [8, 32], strides = [1, 1]} : vector<8x96xf32> to vector<8x32xf32>
    %181 = math.tanh %179 : vector<8x32xf32>
    %182 = arith.mulf %180, %181 : vector<8x32xf32>
    %c24 = arith.constant 24 : index
    %c0_41 = arith.constant 0 : index
    %183 = vector.load %arg13[%c24, %c0_41] : memref<64x32xf32, #tpu.memory_space<vmem>>, vector<8x32xf32>
    tpu.vector_store %arg13[%c24, %c0_41], %166 {strides = array<i32>} : memref<64x32xf32, #tpu.memory_space<vmem>>, vector<8x32xf32>,
    %c32 = arith.constant 32 : index
    %c0_42 = arith.constant 0 : index
    %184 = vector.load %arg14[%c32, %c0_42] : memref<64x32xf32, #tpu.memory_space<vmem>>, vector<8x32xf32>
    tpu.vector_store %arg14[%c32, %c0_42], %182 {strides = array<i32>} : memref<64x32xf32, #tpu.memory_space<vmem>>, vector<8x32xf32>,
    %185 = vector.extract_strided_slice %5 {offsets = [32, 0], sizes = [8, 128], strides = [1, 1]} : vector<64x128xf32> to vector<8x128xf32>
    %186 = arith.truncf %166 : vector<8x32xf32> to vector<8x32xbf16>
    %cst_43 = arith.constant dense<0.000000e+00> : vector<8x128xf32>
    %187 = tpu.matmul %186, %11, %cst_43 {dimension_numbers = #tpu.dot_dimension_numbers<[1], [0], [0], [1], [0, 0, 1, 1], [], []>} : vector<8x32xbf16>, vector<32x128xbf16>, vector<8x128xf32> -> vector<8x128xf32>
    %188 = arith.addf %185, %187 : vector<8x128xf32>
    %189 = vector.extract_strided_slice %10 {offsets = [24, 0], sizes = [8, 128], strides = [1, 1]} : vector<64x128xf32> to vector<8x128xf32>
    %190 = arith.truncf %182 : vector<8x32xf32> to vector<8x32xbf16>
    %cst_44 = arith.constant dense<0.000000e+00> : vector<8x128xf32>
    %191 = tpu.matmul %190, %12, %cst_44 {dimension_numbers = #tpu.dot_dimension_numbers<[1], [0], [0], [1], [0, 0, 1, 1], [], []>} : vector<8x32xbf16>, vector<32x128xbf16>, vector<8x128xf32> -> vector<8x128xf32>
    %192 = arith.addf %189, %191 : vector<8x128xf32>
    %193 = vector.extract_strided_slice %188 {offsets = [0, 0], sizes = [8, 96], strides = [1, 1]} : vector<8x128xf32> to vector<8x96xf32>
    %194 = arith.negf %193 : vector<8x96xf32>
    %195 = math.exp %194 : vector<8x96xf32>
    %cst_45 = arith.constant 1.000000e+00 : f32
    %196 = vector.broadcast %cst_45 : f32 to vector<8x96xf32>
    %197 = arith.addf %196, %195 : vector<8x96xf32>
    %198 = arith.divf %196, %197 : vector<8x96xf32>
    %199 = vector.extract_strided_slice %188 {offsets = [0, 96], sizes = [8, 32], strides = [1, 1]} : vector<8x128xf32> to vector<8x32xf32>
    %200 = math.tanh %199 : vector<8x32xf32>
    %201 = vector.extract_strided_slice %198 {offsets = [0, 32], sizes = [8, 32], strides = [1, 1]} : vector<8x96xf32> to vector<8x32xf32>
    %202 = arith.mulf %201, %163 : vector<8x32xf32>
    %203 = vector.extract_strided_slice %198 {offsets = [0, 0], sizes = [8, 32], strides = [1, 1]} : vector<8x96xf32> to vector<8x32xf32>
    %204 = arith.mulf %203, %200 : vector<8x32xf32>
    %205 = arith.addf %202, %204 : vector<8x32xf32>
    %206 = vector.extract_strided_slice %198 {offsets = [0, 64], sizes = [8, 32], strides = [1, 1]} : vector<8x96xf32> to vector<8x32xf32>
    %207 = math.tanh %205 : vector<8x32xf32>
    %208 = arith.mulf %206, %207 : vector<8x32xf32>
    %209 = vector.extract_strided_slice %192 {offsets = [0, 0], sizes = [8, 96], strides = [1, 1]} : vector<8x128xf32> to vector<8x96xf32>
    %210 = arith.negf %209 : vector<8x96xf32>
    %211 = math.exp %210 : vector<8x96xf32>
    %cst_46 = arith.constant 1.000000e+00 : f32
    %212 = vector.broadcast %cst_46 : f32 to vector<8x96xf32>
    %213 = arith.addf %212, %211 : vector<8x96xf32>
    %214 = arith.divf %212, %213 : vector<8x96xf32>
    %215 = vector.extract_strided_slice %192 {offsets = [0, 96], sizes = [8, 32], strides = [1, 1]} : vector<8x128xf32> to vector<8x32xf32>
    %216 = math.tanh %215 : vector<8x32xf32>
    %217 = vector.extract_strided_slice %214 {offsets = [0, 32], sizes = [8, 32], strides = [1, 1]} : vector<8x96xf32> to vector<8x32xf32>
    %218 = arith.mulf %217, %179 : vector<8x32xf32>
    %219 = vector.extract_strided_slice %214 {offsets = [0, 0], sizes = [8, 32], strides = [1, 1]} : vector<8x96xf32> to vector<8x32xf32>
    %220 = arith.mulf %219, %216 : vector<8x32xf32>
    %221 = arith.addf %218, %220 : vector<8x32xf32>
    %222 = vector.extract_strided_slice %214 {offsets = [0, 64], sizes = [8, 32], strides = [1, 1]} : vector<8x96xf32> to vector<8x32xf32>
    %223 = math.tanh %221 : vector<8x32xf32>
    %224 = arith.mulf %222, %223 : vector<8x32xf32>
    %c32_47 = arith.constant 32 : index
    %c0_48 = arith.constant 0 : index
    %225 = vector.load %arg13[%c32_47, %c0_48] : memref<64x32xf32, #tpu.memory_space<vmem>>, vector<8x32xf32>
    tpu.vector_store %arg13[%c32_47, %c0_48], %208 {strides = array<i32>} : memref<64x32xf32, #tpu.memory_space<vmem>>, vector<8x32xf32>,
    %c24_49 = arith.constant 24 : index
    %c0_50 = arith.constant 0 : index
    %226 = vector.load %arg14[%c24_49, %c0_50] : memref<64x32xf32, #tpu.memory_space<vmem>>, vector<8x32xf32>
    tpu.vector_store %arg14[%c24_49, %c0_50], %224 {strides = array<i32>} : memref<64x32xf32, #tpu.memory_space<vmem>>, vector<8x32xf32>,
    %227 = vector.extract_strided_slice %5 {offsets = [40, 0], sizes = [8, 128], strides = [1, 1]} : vector<64x128xf32> to vector<8x128xf32>
    %228 = arith.truncf %208 : vector<8x32xf32> to vector<8x32xbf16>
    %cst_51 = arith.constant dense<0.000000e+00> : vector<8x128xf32>
    %229 = tpu.matmul %228, %11, %cst_51 {dimension_numbers = #tpu.dot_dimension_numbers<[1], [0], [0], [1], [0, 0, 1, 1], [], []>} : vector<8x32xbf16>, vector<32x128xbf16>, vector<8x128xf32> -> vector<8x128xf32>
    %230 = arith.addf %227, %229 : vector<8x128xf32>
    %231 = vector.extract_strided_slice %10 {offsets = [16, 0], sizes = [8, 128], strides = [1, 1]} : vector<64x128xf32> to vector<8x128xf32>
    %232 = arith.truncf %224 : vector<8x32xf32> to vector<8x32xbf16>
    %cst_52 = arith.constant dense<0.000000e+00> : vector<8x128xf32>
    %233 = tpu.matmul %232, %12, %cst_52 {dimension_numbers = #tpu.dot_dimension_numbers<[1], [0], [0], [1], [0, 0, 1, 1], [], []>} : vector<8x32xbf16>, vector<32x128xbf16>, vector<8x128xf32> -> vector<8x128xf32>
    %234 = arith.addf %231, %233 : vector<8x128xf32>
    %235 = vector.extract_strided_slice %230 {offsets = [0, 0], sizes = [8, 96], strides = [1, 1]} : vector<8x128xf32> to vector<8x96xf32>
    %236 = arith.negf %235 : vector<8x96xf32>
    %237 = math.exp %236 : vector<8x96xf32>
    %cst_53 = arith.constant 1.000000e+00 : f32
    %238 = vector.broadcast %cst_53 : f32 to vector<8x96xf32>
    %239 = arith.addf %238, %237 : vector<8x96xf32>
    %240 = arith.divf %238, %239 : vector<8x96xf32>
    %241 = vector.extract_strided_slice %230 {offsets = [0, 96], sizes = [8, 32], strides = [1, 1]} : vector<8x128xf32> to vector<8x32xf32>
    %242 = math.tanh %241 : vector<8x32xf32>
    %243 = vector.extract_strided_slice %240 {offsets = [0, 32], sizes = [8, 32], strides = [1, 1]} : vector<8x96xf32> to vector<8x32xf32>
    %244 = arith.mulf %243, %205 : vector<8x32xf32>
    %245 = vector.extract_strided_slice %240 {offsets = [0, 0], sizes = [8, 32], strides = [1, 1]} : vector<8x96xf32> to vector<8x32xf32>
    %246 = arith.mulf %245, %242 : vector<8x32xf32>
    %247 = arith.addf %244, %246 : vector<8x32xf32>
    %248 = vector.extract_strided_slice %240 {offsets = [0, 64], sizes = [8, 32], strides = [1, 1]} : vector<8x96xf32> to vector<8x32xf32>
    %249 = math.tanh %247 : vector<8x32xf32>
    %250 = arith.mulf %248, %249 : vector<8x32xf32>
    %251 = vector.extract_strided_slice %234 {offsets = [0, 0], sizes = [8, 96], strides = [1, 1]} : vector<8x128xf32> to vector<8x96xf32>
    %252 = arith.negf %251 : vector<8x96xf32>
    %253 = math.exp %252 : vector<8x96xf32>
    %cst_54 = arith.constant 1.000000e+00 : f32
    %254 = vector.broadcast %cst_54 : f32 to vector<8x96xf32>
    %255 = arith.addf %254, %253 : vector<8x96xf32>
    %256 = arith.divf %254, %255 : vector<8x96xf32>
    %257 = vector.extract_strided_slice %234 {offsets = [0, 96], sizes = [8, 32], strides = [1, 1]} : vector<8x128xf32> to vector<8x32xf32>
    %258 = math.tanh %257 : vector<8x32xf32>
    %259 = vector.extract_strided_slice %256 {offsets = [0, 32], sizes = [8, 32], strides = [1, 1]} : vector<8x96xf32> to vector<8x32xf32>
    %260 = arith.mulf %259, %221 : vector<8x32xf32>
    %261 = vector.extract_strided_slice %256 {offsets = [0, 0], sizes = [8, 32], strides = [1, 1]} : vector<8x96xf32> to vector<8x32xf32>
    %262 = arith.mulf %261, %258 : vector<8x32xf32>
    %263 = arith.addf %260, %262 : vector<8x32xf32>
    %264 = vector.extract_strided_slice %256 {offsets = [0, 64], sizes = [8, 32], strides = [1, 1]} : vector<8x96xf32> to vector<8x32xf32>
    %265 = math.tanh %263 : vector<8x32xf32>
    %266 = arith.mulf %264, %265 : vector<8x32xf32>
    %c40_55 = arith.constant 40 : index
    %c0_56 = arith.constant 0 : index
    %267 = vector.load %arg13[%c40_55, %c0_56] : memref<64x32xf32, #tpu.memory_space<vmem>>, vector<8x32xf32>
    tpu.vector_store %arg13[%c40_55, %c0_56], %250 {strides = array<i32>} : memref<64x32xf32, #tpu.memory_space<vmem>>, vector<8x32xf32>,
    %c16_57 = arith.constant 16 : index
    %c0_58 = arith.constant 0 : index
    %268 = vector.load %arg14[%c16_57, %c0_58] : memref<64x32xf32, #tpu.memory_space<vmem>>, vector<8x32xf32>
    tpu.vector_store %arg14[%c16_57, %c0_58], %266 {strides = array<i32>} : memref<64x32xf32, #tpu.memory_space<vmem>>, vector<8x32xf32>,
    %269 = vector.extract_strided_slice %5 {offsets = [48, 0], sizes = [8, 128], strides = [1, 1]} : vector<64x128xf32> to vector<8x128xf32>
    %270 = arith.truncf %250 : vector<8x32xf32> to vector<8x32xbf16>
    %cst_59 = arith.constant dense<0.000000e+00> : vector<8x128xf32>
    %271 = tpu.matmul %270, %11, %cst_59 {dimension_numbers = #tpu.dot_dimension_numbers<[1], [0], [0], [1], [0, 0, 1, 1], [], []>} : vector<8x32xbf16>, vector<32x128xbf16>, vector<8x128xf32> -> vector<8x128xf32>
    %272 = arith.addf %269, %271 : vector<8x128xf32>
    %273 = vector.extract_strided_slice %10 {offsets = [8, 0], sizes = [8, 128], strides = [1, 1]} : vector<64x128xf32> to vector<8x128xf32>
    %274 = arith.truncf %266 : vector<8x32xf32> to vector<8x32xbf16>
    %cst_60 = arith.constant dense<0.000000e+00> : vector<8x128xf32>
    %275 = tpu.matmul %274, %12, %cst_60 {dimension_numbers = #tpu.dot_dimension_numbers<[1], [0], [0], [1], [0, 0, 1, 1], [], []>} : vector<8x32xbf16>, vector<32x128xbf16>, vector<8x128xf32> -> vector<8x128xf32>
    %276 = arith.addf %273, %275 : vector<8x128xf32>
    %277 = vector.extract_strided_slice %272 {offsets = [0, 0], sizes = [8, 96], strides = [1, 1]} : vector<8x128xf32> to vector<8x96xf32>
    %278 = arith.negf %277 : vector<8x96xf32>
    %279 = math.exp %278 : vector<8x96xf32>
    %cst_61 = arith.constant 1.000000e+00 : f32
    %280 = vector.broadcast %cst_61 : f32 to vector<8x96xf32>
    %281 = arith.addf %280, %279 : vector<8x96xf32>
    %282 = arith.divf %280, %281 : vector<8x96xf32>
    %283 = vector.extract_strided_slice %272 {offsets = [0, 96], sizes = [8, 32], strides = [1, 1]} : vector<8x128xf32> to vector<8x32xf32>
    %284 = math.tanh %283 : vector<8x32xf32>
    %285 = vector.extract_strided_slice %282 {offsets = [0, 32], sizes = [8, 32], strides = [1, 1]} : vector<8x96xf32> to vector<8x32xf32>
    %286 = arith.mulf %285, %247 : vector<8x32xf32>
    %287 = vector.extract_strided_slice %282 {offsets = [0, 0], sizes = [8, 32], strides = [1, 1]} : vector<8x96xf32> to vector<8x32xf32>
    %288 = arith.mulf %287, %284 : vector<8x32xf32>
    %289 = arith.addf %286, %288 : vector<8x32xf32>
    %290 = vector.extract_strided_slice %282 {offsets = [0, 64], sizes = [8, 32], strides = [1, 1]} : vector<8x96xf32> to vector<8x32xf32>
    %291 = math.tanh %289 : vector<8x32xf32>
    %292 = arith.mulf %290, %291 : vector<8x32xf32>
    %293 = vector.extract_strided_slice %276 {offsets = [0, 0], sizes = [8, 96], strides = [1, 1]} : vector<8x128xf32> to vector<8x96xf32>
    %294 = arith.negf %293 : vector<8x96xf32>
    %295 = math.exp %294 : vector<8x96xf32>
    %cst_62 = arith.constant 1.000000e+00 : f32
    %296 = vector.broadcast %cst_62 : f32 to vector<8x96xf32>
    %297 = arith.addf %296, %295 : vector<8x96xf32>
    %298 = arith.divf %296, %297 : vector<8x96xf32>
    %299 = vector.extract_strided_slice %276 {offsets = [0, 96], sizes = [8, 32], strides = [1, 1]} : vector<8x128xf32> to vector<8x32xf32>
    %300 = math.tanh %299 : vector<8x32xf32>
    %301 = vector.extract_strided_slice %298 {offsets = [0, 32], sizes = [8, 32], strides = [1, 1]} : vector<8x96xf32> to vector<8x32xf32>
    %302 = arith.mulf %301, %263 : vector<8x32xf32>
    %303 = vector.extract_strided_slice %298 {offsets = [0, 0], sizes = [8, 32], strides = [1, 1]} : vector<8x96xf32> to vector<8x32xf32>
    %304 = arith.mulf %303, %300 : vector<8x32xf32>
    %305 = arith.addf %302, %304 : vector<8x32xf32>
    %306 = vector.extract_strided_slice %298 {offsets = [0, 64], sizes = [8, 32], strides = [1, 1]} : vector<8x96xf32> to vector<8x32xf32>
    %307 = math.tanh %305 : vector<8x32xf32>
    %308 = arith.mulf %306, %307 : vector<8x32xf32>
    %c48_63 = arith.constant 48 : index
    %c0_64 = arith.constant 0 : index
    %309 = vector.load %arg13[%c48_63, %c0_64] : memref<64x32xf32, #tpu.memory_space<vmem>>, vector<8x32xf32>
    tpu.vector_store %arg13[%c48_63, %c0_64], %292 {strides = array<i32>} : memref<64x32xf32, #tpu.memory_space<vmem>>, vector<8x32xf32>,
    %c8_65 = arith.constant 8 : index
    %c0_66 = arith.constant 0 : index
    %310 = vector.load %arg14[%c8_65, %c0_66] : memref<64x32xf32, #tpu.memory_space<vmem>>, vector<8x32xf32>
    tpu.vector_store %arg14[%c8_65, %c0_66], %308 {strides = array<i32>} : memref<64x32xf32, #tpu.memory_space<vmem>>, vector<8x32xf32>,
    %311 = vector.extract_strided_slice %5 {offsets = [56, 0], sizes = [8, 128], strides = [1, 1]} : vector<64x128xf32> to vector<8x128xf32>
    %312 = arith.truncf %292 : vector<8x32xf32> to vector<8x32xbf16>
    %cst_67 = arith.constant dense<0.000000e+00> : vector<8x128xf32>
    %313 = tpu.matmul %312, %11, %cst_67 {dimension_numbers = #tpu.dot_dimension_numbers<[1], [0], [0], [1], [0, 0, 1, 1], [], []>} : vector<8x32xbf16>, vector<32x128xbf16>, vector<8x128xf32> -> vector<8x128xf32>
    %314 = arith.addf %311, %313 : vector<8x128xf32>
    %315 = vector.extract_strided_slice %10 {offsets = [0, 0], sizes = [8, 128], strides = [1, 1]} : vector<64x128xf32> to vector<8x128xf32>
    %316 = arith.truncf %308 : vector<8x32xf32> to vector<8x32xbf16>
    %cst_68 = arith.constant dense<0.000000e+00> : vector<8x128xf32>
    %317 = tpu.matmul %316, %12, %cst_68 {dimension_numbers = #tpu.dot_dimension_numbers<[1], [0], [0], [1], [0, 0, 1, 1], [], []>} : vector<8x32xbf16>, vector<32x128xbf16>, vector<8x128xf32> -> vector<8x128xf32>
    %318 = arith.addf %315, %317 : vector<8x128xf32>
    %319 = vector.extract_strided_slice %314 {offsets = [0, 0], sizes = [8, 96], strides = [1, 1]} : vector<8x128xf32> to vector<8x96xf32>
    %320 = arith.negf %319 : vector<8x96xf32>
    %321 = math.exp %320 : vector<8x96xf32>
    %cst_69 = arith.constant 1.000000e+00 : f32
    %322 = vector.broadcast %cst_69 : f32 to vector<8x96xf32>
    %323 = arith.addf %322, %321 : vector<8x96xf32>
    %324 = arith.divf %322, %323 : vector<8x96xf32>
    %325 = vector.extract_strided_slice %314 {offsets = [0, 96], sizes = [8, 32], strides = [1, 1]} : vector<8x128xf32> to vector<8x32xf32>
    %326 = math.tanh %325 : vector<8x32xf32>
    %327 = vector.extract_strided_slice %324 {offsets = [0, 32], sizes = [8, 32], strides = [1, 1]} : vector<8x96xf32> to vector<8x32xf32>
    %328 = arith.mulf %327, %289 : vector<8x32xf32>
    %329 = vector.extract_strided_slice %324 {offsets = [0, 0], sizes = [8, 32], strides = [1, 1]} : vector<8x96xf32> to vector<8x32xf32>
    %330 = arith.mulf %329, %326 : vector<8x32xf32>
    %331 = arith.addf %328, %330 : vector<8x32xf32>
    %332 = vector.extract_strided_slice %324 {offsets = [0, 64], sizes = [8, 32], strides = [1, 1]} : vector<8x96xf32> to vector<8x32xf32>
    %333 = math.tanh %331 : vector<8x32xf32>
    %334 = arith.mulf %332, %333 : vector<8x32xf32>
    %335 = vector.extract_strided_slice %318 {offsets = [0, 0], sizes = [8, 96], strides = [1, 1]} : vector<8x128xf32> to vector<8x96xf32>
    %336 = arith.negf %335 : vector<8x96xf32>
    %337 = math.exp %336 : vector<8x96xf32>
    %cst_70 = arith.constant 1.000000e+00 : f32
    %338 = vector.broadcast %cst_70 : f32 to vector<8x96xf32>
    %339 = arith.addf %338, %337 : vector<8x96xf32>
    %340 = arith.divf %338, %339 : vector<8x96xf32>
    %341 = vector.extract_strided_slice %318 {offsets = [0, 96], sizes = [8, 32], strides = [1, 1]} : vector<8x128xf32> to vector<8x32xf32>
    %342 = math.tanh %341 : vector<8x32xf32>
    %343 = vector.extract_strided_slice %340 {offsets = [0, 32], sizes = [8, 32], strides = [1, 1]} : vector<8x96xf32> to vector<8x32xf32>
    %344 = arith.mulf %343, %305 : vector<8x32xf32>
    %345 = vector.extract_strided_slice %340 {offsets = [0, 0], sizes = [8, 32], strides = [1, 1]} : vector<8x96xf32> to vector<8x32xf32>
    %346 = arith.mulf %345, %342 : vector<8x32xf32>
    %347 = arith.addf %344, %346 : vector<8x32xf32>
    %348 = vector.extract_strided_slice %340 {offsets = [0, 64], sizes = [8, 32], strides = [1, 1]} : vector<8x96xf32> to vector<8x32xf32>
    %349 = math.tanh %347 : vector<8x32xf32>
    %350 = arith.mulf %348, %349 : vector<8x32xf32>
    %c56_71 = arith.constant 56 : index
    %c0_72 = arith.constant 0 : index
    %351 = vector.load %arg13[%c56_71, %c0_72] : memref<64x32xf32, #tpu.memory_space<vmem>>, vector<8x32xf32>
    tpu.vector_store %arg13[%c56_71, %c0_72], %334 {strides = array<i32>} : memref<64x32xf32, #tpu.memory_space<vmem>>, vector<8x32xf32>,
    %c0_73 = arith.constant 0 : index
    %c0_74 = arith.constant 0 : index
    %352 = vector.load %arg14[%c0_73, %c0_74] : memref<64x32xf32, #tpu.memory_space<vmem>>, vector<8x32xf32>
    tpu.vector_store %arg14[%c0_73, %c0_74], %350 {strides = array<i32>} : memref<64x32xf32, #tpu.memory_space<vmem>>, vector<8x32xf32>,
    %c0_75 = arith.constant 0 : index
    %c0_76 = arith.constant 0 : index
    %353 = vector.load %arg13[%c0_75, %c0_76] : memref<64x32xf32, #tpu.memory_space<vmem>>, vector<64x32xf32>
    %c0_77 = arith.constant 0 : index
    %c0_78 = arith.constant 0 : index
    %354 = vector.load %arg7[%c0_77, %c0_78] : memref<32x32xf32, #tpu.memory_space<vmem>>, vector<32x32xf32>
    %cst_79 = arith.constant dense<0.000000e+00> : vector<64x32xf32>
    %355 = tpu.matmul %353, %354, %cst_79 {dimension_numbers = #tpu.dot_dimension_numbers<[1], [0], [0], [1], [0, 0, 1, 1], [], []>} : vector<64x32xf32>, vector<32x32xf32>, vector<64x32xf32> -> vector<64x32xf32>
    %c0_80 = arith.constant 0 : index
    %c0_81 = arith.constant 0 : index
    %356 = vector.load %arg14[%c0_80, %c0_81] : memref<64x32xf32, #tpu.memory_space<vmem>>, vector<64x32xf32>
    %c0_82 = arith.constant 0 : index
    %c0_83 = arith.constant 0 : index
    %357 = vector.load %arg8[%c0_82, %c0_83] : memref<32x32xf32, #tpu.memory_space<vmem>>, vector<32x32xf32>
    %cst_84 = arith.constant dense<0.000000e+00> : vector<64x32xf32>
    %358 = tpu.matmul %356, %357, %cst_84 {dimension_numbers = #tpu.dot_dimension_numbers<[1], [0], [0], [1], [0, 0, 1, 1], [], []>} : vector<64x32xf32>, vector<32x32xf32>, vector<64x32xf32> -> vector<64x32xf32>
    %359 = arith.addf %355, %358 : vector<64x32xf32>
    %c0_85 = arith.constant 0 : index
    %c0_86 = arith.constant 0 : index
    %360 = vector.load %arg9[%c0_85, %c0_86] : memref<1x32xf32, #tpu.memory_space<vmem>>, vector<1x32xf32>
    %361 = vector.broadcast %360 : vector<1x32xf32> to vector<64x32xf32>
    %362 = arith.addf %359, %361 : vector<64x32xf32>
    %cst_87 = arith.constant 0.000000e+00 : f32
    %363 = vector.broadcast %cst_87 : f32 to vector<64x32xf32>
    %364 = arith.maximumf %362, %363 : vector<64x32xf32>
    %c0_88 = arith.constant 0 : index
    %c0_89 = arith.constant 0 : index
    %365 = vector.load %arg10[%c0_88, %c0_89] : memref<32x128xf32, #tpu.memory_space<vmem>>, vector<32x128xf32>
    %cst_90 = arith.constant dense<0.000000e+00> : vector<64x128xf32>
    %366 = tpu.matmul %364, %365, %cst_90 {dimension_numbers = #tpu.dot_dimension_numbers<[1], [0], [0], [1], [0, 0, 1, 1], [], []>} : vector<64x32xf32>, vector<32x128xf32>, vector<64x128xf32> -> vector<64x128xf32>
    %c0_91 = arith.constant 0 : index
    %c0_92 = arith.constant 0 : index
    %367 = vector.load %arg11[%c0_91, %c0_92] : memref<1x128xf32, #tpu.memory_space<vmem>>, vector<1x128xf32>
    %368 = vector.broadcast %367 : vector<1x128xf32> to vector<64x128xf32>
    %369 = arith.addf %366, %368 : vector<64x128xf32>
    %c0_93 = arith.constant 0 : index
    %c0_94 = arith.constant 0 : index
    %370 = vector.load %arg12[%c0_93, %c0_94] : memref<64x128xf32, #tpu.memory_space<vmem>>, vector<64x128xf32>
    tpu.vector_store %arg12[%c0_93, %c0_94], %369 {strides = array<i32>} : memref<64x128xf32, #tpu.memory_space<vmem>>, vector<64x128xf32>,
    return
  }
}

</mosaic_0001>

<bundles_post_ra>
// kernel: grasp_phase_detector.1
= control target key start
LH: loop header
LB: loop body
LE: loop exit
PB: predicated region body
PF: predicated region fallthrough
CT: control target
= control target key end

     0   :  { %vm59_vm0 = vcmask 130048   ;;  %v2595_v11 = vmov 0.0   ;;  %vm2596_vm1 = vmmov 0   ;;  %v2597_v19 = vmov 0   ;;  %s2599_s14 = smov 64   ;;  %s3192_s1 = inlined_call_operand.vmem [shape: f32[16,128], index: 1, kind: input, shape index: {}]   ;;  %s3193_s0 = inlined_call_operand.vmem [shape: f32[64,16], index: 0, kind: input, shape index: {}]   ;;  %s3194_s2 = inlined_call_operand.vmem [shape: f32[16,128], index: 2, kind: input, shape index: {}]   ;;  %s3195_s6 = inlined_call_operand.vmem [shape: bf16[32,128], index: 6, kind: input, shape index: {}]   ;;  %s3196_s5 = inlined_call_operand.vmem [shape: bf16[32,128], index: 5, kind: input, shape index: {}]   ;;  %s3197_s3 = inlined_call_operand.vmem [shape: f32[1,128], index: 3, kind: input, shape index: {}]   ;;  %s3198_s4 = inlined_call_operand.vmem [shape: f32[1,128], index: 4, kind: input, shape index: {}]   ;;  %s3199_s8 = inlined_call_operand.vmem [shape: f32[32,32], index: 8, kind: input, shape index: {}]   ;;  %s3200_s7 = inlined_call_operand.vmem [shape: f32[32,32], index: 7, kind: input, shape index: {}]   ;;  %s3201_s10 = inlined_call_operand.vmem [shape: f32[32,128], index: 10, kind: input, shape index: {}]   ;;  %s3202_s9 = inlined_call_operand.vmem [shape: f32[1,32], index: 9, kind: input, shape index: {}]   ;;  %s3203_s11 = inlined_call_operand.vmem [shape: f32[1,128], index: 11, kind: input, shape index: {}]   ;;  %s3204_s12 = inlined_call_operand.vmem [shape: f32[64,128], index: 12, kind: output, shape index: {}]  }
   0x1   :  { %v50_v0 = vld [vmem:[%s3192_s1] sm:$0xff]  ;;  %v51_v1 = vld [vmem:[%s3192_s1 + $0x8] sm:$0xff]  ;;  %v48_v8 = vld [vmem:[%s3193_s0 + $0x30] sm:$0xff]  ;;  %vm323_vm2 = vcmask 261120  }
   0x2   :  { %v46_v2 = vld [vmem:[%s3193_s0 + $0x20] sm:$0xff]  ;;  %v2416_v3 = vpack.c.bf16 %v51_v1, %v50_v0  ;;  %v190_v5 = vld [vmem:[%s3194_s2 + $0x8] sm:$0xff]  ;;  %v49_v13 = vld [vmem:[%s3193_s0 + $0x38] sm:$0xff] }
   0x3   :  { %2206 = vmatprep.mubr.msk.f32.mxu1 %vm59_vm0, %v46_v2  ;;  %v189_v4 = vld [vmem:[%s3194_s2] sm:$0xff]  ;;  %v47_v7 = vld [vmem:[%s3193_s0 + $0x28] sm:$0xff]  ;;  %v44_v14 = vld [vmem:[%s3193_s0 + $0x10] sm:$0xff] }
   0x4   :  { %v2420_v6 = vpack.c.bf16 %v190_v5, %v189_v4  ;;  %2448 = vmatprep.subr.bf16.mxu1 %v2416_v3  ;;  %2417 = vmatprep.subr.bf16.mxu0 %v2416_v3  ;;  %v42_v9 = vld [vmem:[%s3193_s0] sm:$0xff]  ;;  %v43_v10 = vld [vmem:[%s3193_s0 + $0x8] sm:$0xff]  ;;  %v45_v16 = vld [vmem:[%s3193_s0 + $0x18] sm:$0xff] }
   0x5   :  { %2449 = vmatpush3.bf16.msra.mxu1 %v2416_v3  ;;  %2419 = vmatpush3.bf16.msra.mxu0 %v2416_v3  ;;  %v2698_v12 = vld [vmem:[%s3196_s5] sm:$0xff]   ;;  %v2714_v15 = vld [vmem:[%s3196_s5 + $0x8] sm:$0xff]  }
   0x6   :  { %2421 = vmatprep.subr.bf16.mxu1 %v2420_v6  ;;  %2200 = vmatprep.mubr.msk.f32.mxu0 %vm59_vm0, %v42_v9  ;;  %v2727_v17 = vld [vmem:[%s3195_s6] sm:$0xff]   ;;  %v2739_v18 = vld [vmem:[%s3195_s6 + $0x8] sm:$0xff]  }
   0x7   :  { %2228 = vmatprep.subr.bf16.mxu0 %v2595_v11  ;;  %v2014_v20 = vld [vmem:[%s3197_s3] ss:$0 sm:$0xff] }
   0x8   :  { %2207 = vmatmul.mubr.msk.f32.vlgmr.msra.gmra.mrb[0].mxu1 %vm59_vm0, %v47_v7  ;;  %2201 = vmatmul.mubr.msk.f32.vlgmr.msra.gmra.mrb[0].mxu0 %vm59_vm0, %v43_v10  ;;  %v2023_v35 = vld [vmem:[%s3198_s4] ss:$0 sm:$0xff]  ;;  %s2598_s4 = smov 32  }
   0x9   :  { %2423 = vmatpush3.bf16.msra.mxu1 %v2420_v6  ;;  %2209 = vmatprep.mubr.msk.f32.mxu1 %vm59_vm0, %v48_v8 }
   0xa   :  { %2236 = vmatprep.subr.bf16.mxu1 %v2595_v11  ;;  %2229 = vmatpush3.bf16.msra.mxu0 %v2698_v12 }
   0xb   :  { %2203 = vmatprep.mubr.msk.f32.mxu0 %vm59_vm0, %v44_v14  ;;  %2230 = vmatprep.subr.bf16.mxu0 %v2595_v11 }
   0xc   :  { %2210 = vmatmul.mubr.msk.f32.gmra.mrb[2].mxu1 %vm59_vm0, %v49_v13  ;;  %2204 = vmatmul.mubr.msk.f32.gmra.mrb[2].mxu0 %vm59_vm0, %v45_v16 }
   0xd   :  { %2216 = vmatprep.mubr.msk.f32.mxu1 %vm59_vm0, %v42_v9  ;;  %2232 = vmatprep.mubr.msk.bf16.mxu0 %vm2596_vm1, %v2595_v11 }
   0xe   :  { %2231 = vmatpush3.bf16.msra.mxu0 %v2714_v15 }
   0xf   :  { %2244 = vmatprep.subr.bf16.mxu0 %v2595_v11 }
  0x10   :  { %2217 = vmatmul.mubr.msk.f32.vlgmr.msra.gmra.mrb[4].mxu1 %vm59_vm0, %v43_v10 }
  0x11   :  { %2237 = vmatpush3.bf16.msra.mxu1 %v2727_v17  ;;  %2219 = vmatprep.mubr.msk.f32.mxu1 %vm59_vm0, %v44_v14 }
  0x12   :  { %2238 = vmatprep.subr.bf16.mxu1 %v2595_v11  ;;  %2233 = vmatmul.mubr.bf16.vlgmr.msra.gmra.mrb[4].mxu0 %v2597_v19 }
  0x13   :  { %2245 = vmatpush3.bf16.msra.mxu0 %v2698_v12  ;;  %2248 = vmatprep.mubr.msk.bf16.mxu0 %vm2596_vm1, %v2595_v11 }
  0x14   :  { %2220 = vmatmul.mubr.msk.f32.gmra.mrb[6].mxu1 %vm59_vm0, %v45_v16  ;;  %2246 = vmatprep.subr.bf16.mxu0 %v2595_v11 }
  0x15   :  { %2222 = vmatprep.mubr.msk.f32.mxu1 %vm59_vm0, %v46_v2  ;;  %2239 = vmatpush3.bf16.msra.mxu1 %v2739_v18 }
  0x16   :  { %2252 = vmatprep.subr.bf16.mxu1 %v2595_v11 }
  0x17   :  { %2247 = vmatpush3.bf16.msra.mxu0 %v2714_v15 }
  0x18   :  { %2223 = vmatmul.mubr.msk.f32.gmra.mrb[8].mxu1 %vm59_vm0, %v47_v7  ;;  %2260 = vmatprep.subr.bf16.mxu0 %v2595_v11 }
  0x19   :  { %2225 = vmatprep.mubr.msk.f32.mxu1 %vm59_vm0, %v48_v8 }
  0x1c   :  { %2226 = vmatmul.mubr.msk.f32.gmra.mrb[10].mxu1 %vm59_vm0, %v49_v13 }
  0x1d   :  { %2240 = vmatprep.mubr.msk.bf16.mxu1 %vm2596_vm1, %v2595_v11 }
  0x20   :  { %2241 = vmatmul.mubr.bf16.vlgmr.msra.gmra.mrb[12].mxu1 %v2597_v19 }
  0x21   :  { %2253 = vmatpush3.bf16.msra.mxu1 %v2727_v17  ;;  %2256 = vmatprep.mubr.msk.bf16.mxu1 %vm2596_vm1, %v2595_v11 }
  0x22   :  { %2254 = vmatprep.subr.bf16.mxu1 %v2595_v11 }
  0x25   :  { %2255 = vmatpush3.bf16.msra.mxu1 %v2739_v18 }
  0x26   :  { %2268 = vmatprep.subr.bf16.mxu1 %v2595_v11 }
  0xdb   :  { %v2208_v21 = vpop.f32.mrb[0].mxu1  ;;  %v2202_v22 = vpop.f32.mrb[0].mxu0 }
  0xdc   :  { %v2766_v23 = vadd.f32 %v2208_v21, %v2014_v20  ;;  %v170_v24 = vpop.f32.mrb[1].mxu1  ;;  %v2768_v25 = vadd.f32 %v2202_v22, %v2014_v20  ;;  %v150_v26 = vpop.f32.mrb[1].mxu0 }
  0xdd   :  { %v2770_v27 = vadd.f32 %v2014_v20, %v170_v24  ;;  %v151_v37 = vadd.f32 %v2014_v20, %v150_v26 }
  0xdf   :  { %v2211_v28 = vpop.f32.mrb[2].mxu1  ;;  %v2205_v29 = vpop.f32.mrb[2].mxu0 }
  0xe0   :  { %v2772_v30 = vadd.f32 %v2211_v28, %v2014_v20  ;;  %v180_v31 = vpop.f32.mrb[3].mxu1  ;;  %v2774_v32 = vadd.f32 %v2205_v29, %v2014_v20  ;;  %v160_v33 = vpop.f32.mrb[3].mxu0 }
  0xe1   :  { %v2776_v34 = vadd.f32 %v2014_v20, %v180_v31  ;;  %v2781_v36 = vadd.f32 %v2014_v20, %v160_v33 }
  0xe3   :  { %v2218_v38 = vpop.f32.mrb[4].mxu1 }
  0xe4   :  { %v2783_v39 = vadd.f32 %v2218_v38, %v2023_v35  ;;  %v264_v40 = vpop.f32.mrb[5].mxu1 }
  0xe5   :  { %v2785_v41 = vadd.f32 %v2023_v35, %v264_v40  ;;  %v361_v42 = vpop.f32.mrb[4].mxu0 }
  0xe6   :  { %v367_v43 = vadd.f32 %v361_v42, %v151_v37  ;;  %v2234_v44 = vpop.f32.mrb[5].mxu0 }
  0xe7   :  { %v2221_v45 = vpop.f32.mrb[6].mxu1  ;;  %v364_v46 = vpop.f32.mrb[6].mxu0 }
  0xe8   :  { %v2787_v47 = vadd.f32 %v2221_v45, %v2023_v35  ;;  %v274_v48 = vpop.f32.mrb[7].mxu1  ;;  %v2235_v49 = vpop.f32.mrb[7].mxu0  ;;  %v2036_v3 = vmul.f32 -1.442695, %v367_v43 }
  0xe9   :  { %v2789_v50 = vadd.f32 %v2023_v35, %v274_v48 }
  0xeb   :  { %v2224_v51 = vpop.f32.mrb[8].mxu1 }
  0xec   :  { %v2791_v52 = vadd.f32 %v2224_v51, %v2023_v35  ;;  %v284_v53 = vpop.f32.mrb[9].mxu1 }
  0xed   :  { %v2793_v54 = vadd.f32 %v2023_v35, %v284_v53 }
  0xef   :  { %v2227_v55 = vpop.f32.mrb[10].mxu1 }
  0xf0   :  { %v294_v56 = vpop.f32.mrb[11].mxu1  ;;  %v300_v58 = vadd.f32 %v2227_v55, %v2023_v35 }
  0xf1   :  { %v2795_v57 = vadd.f32 %v2023_v35, %v294_v56 }
  0xf3   :  { %v414_v59 = vpop.f32.mrb[12].mxu1 }
  0xf4   :  { %v420_v60 = vadd.f32 %v414_v59, %v300_v58  ;;  %v2242_v61 = vpop.f32.mrb[13].mxu1 }
  0xf5   :  { %v417_v62 = vpop.f32.mrb[14].mxu1 }
  0xf6   :  { %2467 = vtanh.f32 %v420_v60  ;;  %v2243_v63 = vpop.f32.mrb[15].mxu1  ;;  %v2037_v2 = vmul.f32 -1.442695, %v420_v60 }
  0xf7   :  { %2469 = vtanh.f32 %v367_v43 }
  0xf8   :  { %2471 = vpow2.f32 %v2037_v2 }
  0xf9   :  { %2473 = vpow2.f32 %v2036_v3 }
 0x100   :  { %v2468_v0 = vpop.eup %2467 }
 0x101   :  { %454 = vrot.lane.b32.xlu0 %v2468_v0, %s2598_s4  ;;  %v2470_v1 = vpop.eup %2469 }
 0x102   :  { %v2472_v4 = vpop.eup %2471 }
 0x103   :  { %v448_v5 = vadd.f32 1.0, %v2472_v4  ;;  %v2474_v6 = vpop.eup %2473 }
 0x104   :  { %v424_v7 = vadd.f32 1.0, %v2474_v6 }
 0x105   :  { %430 = vrot.lane.b32.xlu0 %v2470_v1, %s2598_s4  ;;  %2475 = vrcp.f32 %v448_v5 }
 0x106   :  { %2477 = vrcp.f32 %v424_v7 }
 0x10f   :  { %v2476_v8 = vpop.eup %2475 }
 0x110   :  { %v2478_v13 = vpop.eup %2477  ;;  %v452_v19 = vmul.f32 0.0, %v2476_v8 }
 0x111   :  { %v428_v22 = vmul.f32 0.0, %v2478_v13 }
 0x173   :  { %v455_v9 = vpop.permute.xlu0 %454 }
 0x174   :  { %v457_v10 = vmul.f32 %v2476_v8, %v455_v9 }
 0x176   :  { %459 = vrot.lane.b32.xlu1 %v457_v10, %s2598_s4 }
 0x177   :  { %v431_v14 = vpop.permute.xlu0 %430 }
 0x178   :  { %v433_v16 = vmul.f32 %v2478_v13, %v431_v14 }
 0x17a   :  { %435 = vrot.lane.b32.xlu1 %v433_v16, %s2598_s4 }
 0x1e8   :  { %v460_v20 = vpop.permute.xlu1 %459 }
 0x1e9   :  { %v2801_v21 = vadd.f32 %v460_v20, %v452_v19 }
 0x1eb   :  { %2479 = vtanh.f32 %v2801_v21 }
 0x1ec   :  { %v436_v24 = vpop.permute.xlu1 %435 }
 0x1ed   :  { %v2804_v26 = vadd.f32 %v436_v24, %v428_v22 }
 0x1ef   :  { %2481 = vtanh.f32 %v2804_v26 }
 0x1f5   :  { %v2480_v28 = vpop.eup %2479 }
 0x1f6   :  { %465 = vrot.lane.b32.xlu0 %v2480_v28, %s2598_s4 }
 0x1f9   :  { %v2482_v29 = vpop.eup %2481 }
 0x1fa   :  { %441 = vrot.lane.b32.xlu1 %v2482_v29, %s2598_s4 }
 0x268   :  { %v466_v31 = vpop.permute.xlu0 %465 }
 0x269   :  { %v2809_v33 = vmul.f32 %v2476_v8, %v466_v31 }
 0x26b   :  { %v527_v35 = vpack.c.bf16 %v2809_v33, %v2809_v33 }
 0x26c   :  { %v442_v37 = vpop.permute.xlu1 %441 }
 0x26d   :  { %v2813_v38 = vmul.f32 %v2478_v13, %v442_v37  ;;  %529 = vrot.lane.b32.xlu0 %v527_v35, %s2599_s14 }
 0x26f   :  { %v479_v40 = vpack.c.bf16 %v2813_v38, %v2813_v38 }
 0x271   :  { %481 = vrot.lane.b32.xlu1 %v479_v40, %s2599_s14 }
 0x2df   :  { %v530_v42 = vpop.permute.xlu0 %529 }
 0x2e0   :  { %2257 = vmatmul.mubr.msk.bf16.vlgmr.msra.gmra.mrb[16].mxu1 %vm323_vm2, %v530_v42 }
 0x2e1   :  { %2269 = vmatpush3.bf16.msra.mxu1 %v2727_v17  ;;  %2272 = vmatprep.mubr.msk.bf16.mxu1 %vm2596_vm1, %v2595_v11 }
 0x2e2   :  { %2270 = vmatprep.subr.bf16.mxu1 %v2595_v11 }
 0x2e3   :  { %v482_v43 = vpop.permute.xlu1 %481 }
 0x2e4   :  { %2249 = vmatmul.mubr.msk.bf16.vlgmr.msra.gmra.mrb[8].mxu0 %vm323_vm2, %v482_v43 }
 0x2e5   :  { %2261 = vmatpush3.bf16.msra.mxu0 %v2698_v12  ;;  %2271 = vmatpush3.bf16.msra.mxu1 %v2739_v18 }
 0x2e6   :  { %2262 = vmatprep.subr.bf16.mxu0 %v2595_v11  ;;  %2264 = vmatprep.mubr.msk.bf16.mxu0 %vm2596_vm1, %v2595_v11 }
 0x2e7   :  { %2284 = vmatprep.subr.bf16.mxu1 %v2595_v11 }
 0x2e9   :  { %2263 = vmatpush3.bf16.msra.mxu0 %v2714_v15 }
 0x2ea   :  { %2276 = vmatprep.subr.bf16.mxu0 %v2595_v11 }
 0x3b3   :  { %v568_v44 = vpop.f32.mrb[16].mxu1 }
 0x3b4   :  { %v574_v45 = vadd.f32 %v568_v44, %v2795_v57  ;;  %v2258_v46 = vpop.f32.mrb[17].mxu1 }
 0x3b5   :  { %v571_v48 = vpop.f32.mrb[18].mxu1 }
 0x3b6   :  { %2483 = vtanh.f32 %v574_v45  ;;  %v2259_v49 = vpop.f32.mrb[19].mxu1  ;;  %v2041_v61 = vmul.f32 -1.442695, %v574_v45 }
 0x3b7   :  { %v520_v51 = vpop.f32.mrb[8].mxu0 }
 0x3b8   :  { %v526_v53 = vadd.f32 %v520_v51, %v2768_v25  ;;  %v2250_v55 = vpop.f32.mrb[9].mxu0 }
 0x3b9   :  { %v523_v56 = vpop.f32.mrb[10].mxu0 }
 0x3ba   :  { %2485 = vtanh.f32 %v526_v53  ;;  %v2251_v58 = vpop.f32.mrb[11].mxu0  ;;  %v2040_v57 = vmul.f32 -1.442695, %v526_v53 }
 0x3bb   :  { %2487 = vpow2.f32 %v2041_v61 }
 0x3bc   :  { %2489 = vpow2.f32 %v2040_v57 }
 0x3c0   :  { %v2484_v59 = vpop.eup %2483 }
 0x3c1   :  { %608 = vrot.lane.b32.xlu0 %v2484_v59, %s2598_s4 }
 0x3c4   :  { %v2486_v60 = vpop.eup %2485 }
 0x3c5   :  { %584 = vrot.lane.b32.xlu1 %v2486_v60, %s2598_s4  ;;  %v2488_v62 = vpop.eup %2487 }
 0x3c6   :  { %v602_v63 = vadd.f32 1.0, %v2488_v62  ;;  %v2490_v0 = vpop.eup %2489 }
 0x3c7   :  { %v578_v1 = vadd.f32 1.0, %v2490_v0 }
 0x3c8   :  { %2491 = vrcp.f32 %v602_v63 }
 0x3c9   :  { %2493 = vrcp.f32 %v578_v1 }
 0x3d2   :  { %v2492_v25 = vpop.eup %2491 }
 0x3d3   :  { %v2494_v4 = vpop.eup %2493  ;;  %v606_v7 = vmul.f32 %v2492_v25, %v2801_v21 }
 0x3d4   :  { %v582_v10 = vmul.f32 %v2494_v4, %v2804_v26 }
 0x433   :  { %v609_v2 = vpop.permute.xlu0 %608 }
 0x434   :  { %v611_v3 = vmul.f32 %v2492_v25, %v609_v2 }
 0x436   :  { %613 = vrot.lane.b32.xlu0 %v611_v3, %s2598_s4 }
 0x437   :  { %v585_v5 = vpop.permute.xlu1 %584 }
 0x438   :  { %v587_v6 = vmul.f32 %v2494_v4, %v585_v5 }
 0x43a   :  { %589 = vrot.lane.b32.xlu1 %v587_v6, %s2598_s4 }
 0x4a8   :  { %v614_v8 = vpop.permute.xlu0 %613 }
 0x4a9   :  { %v2840_v9 = vadd.f32 %v614_v8, %v606_v7 }
 0x4ab   :  { %2495 = vtanh.f32 %v2840_v9 }
 0x4ac   :  { %v590_v13 = vpop.permute.xlu1 %589 }
 0x4ad   :  { %v2844_v14 = vadd.f32 %v590_v13, %v582_v10 }
 0x4af   :  { %2497 = vtanh.f32 %v2844_v14 }
 0x4b5   :  { %v2496_v16 = vpop.eup %2495 }
 0x4b6   :  { %619 = vrot.lane.b32.xlu0 %v2496_v16, %s2598_s4 }
 0x4b9   :  { %v2498_v19 = vpop.eup %2497 }
 0x4ba   :  { %595 = vrot.lane.b32.xlu1 %v2498_v19, %s2598_s4 }
 0x528   :  { %v620_v20 = vpop.permute.xlu0 %619 }
 0x529   :  { %v2849_v21 = vmul.f32 %v2492_v25, %v620_v20 }
 0x52b   :  { %v681_v22 = vpack.c.bf16 %v2849_v21, %v2849_v21 }
 0x52c   :  { %v596_v24 = vpop.permute.xlu1 %595 }
 0x52d   :  { %v2853_v28 = vmul.f32 %v2494_v4, %v596_v24  ;;  %683 = vrot.lane.b32.xlu0 %v681_v22, %s2599_s14 }
 0x52f   :  { %v633_v26 = vpack.c.bf16 %v2853_v28, %v2853_v28 }
 0x531   :  { %635 = vrot.lane.b32.xlu1 %v633_v26, %s2599_s14 }
 0x59f   :  { %v684_v29 = vpop.permute.xlu0 %683 }
 0x5a0   :  { %2273 = vmatmul.mubr.msk.bf16.vlgmr.msra.gmra.mrb[20].mxu1 %vm323_vm2, %v684_v29 }
 0x5a1   :  { %2285 = vmatpush3.bf16.msra.mxu1 %v2727_v17  ;;  %2288 = vmatprep.mubr.msk.bf16.mxu1 %vm2596_vm1, %v2595_v11 }
 0x5a2   :  { %2286 = vmatprep.subr.bf16.mxu1 %v2595_v11 }
 0x5a3   :  { %v636_v31 = vpop.permute.xlu1 %635 }
 0x5a4   :  { %2265 = vmatmul.mubr.msk.bf16.vlgmr.msra.gmra.mrb[12].mxu0 %vm323_vm2, %v636_v31 }
 0x5a5   :  { %2277 = vmatpush3.bf16.msra.mxu0 %v2698_v12  ;;  %2287 = vmatpush3.bf16.msra.mxu1 %v2739_v18 }
 0x5a6   :  { %2278 = vmatprep.subr.bf16.mxu0 %v2595_v11  ;;  %2280 = vmatprep.mubr.msk.bf16.mxu0 %vm2596_vm1, %v2595_v11 }
 0x5a7   :  { %2300 = vmatprep.subr.bf16.mxu1 %v2595_v11 }
 0x5a9   :  { %2279 = vmatpush3.bf16.msra.mxu0 %v2714_v15 }
 0x5aa   :  { %2292 = vmatprep.subr.bf16.mxu0 %v2595_v11 }
 0x673   :  { %v722_v35 = vpop.f32.mrb[20].mxu1 }
 0x674   :  { %v728_v37 = vadd.f32 %v722_v35, %v2791_v52  ;;  %v2274_v40 = vpop.f32.mrb[21].mxu1 }
 0x675   :  { %v725_v42 = vpop.f32.mrb[22].mxu1 }
 0x676   :  { %2499 = vtanh.f32 %v728_v37  ;;  %v2275_v43 = vpop.f32.mrb[23].mxu1  ;;  %v2045_v55 = vmul.f32 -1.442695, %v728_v37 }
 0x677   :  { %v674_v44 = vpop.f32.mrb[12].mxu0 }
 0x678   :  { %v680_v45 = vadd.f32 %v674_v44, %v2781_v36  ;;  %v2266_v46 = vpop.f32.mrb[13].mxu0 }
 0x679   :  { %v677_v48 = vpop.f32.mrb[14].mxu0 }
 0x67a   :  { %2501 = vtanh.f32 %v680_v45  ;;  %v2267_v49 = vpop.f32.mrb[15].mxu0  ;;  %v2044_v52 = vmul.f32 -1.442695, %v680_v45 }
 0x67b   :  { %2503 = vpow2.f32 %v2045_v55 }
 0x67c   :  { %2505 = vpow2.f32 %v2044_v52 }
 0x680   :  { %v2500_v51 = vpop.eup %2499 }
 0x681   :  { %762 = vrot.lane.b32.xlu0 %v2500_v51, %s2598_s4 }
 0x684   :  { %v2502_v53 = vpop.eup %2501 }
 0x685   :  { %738 = vrot.lane.b32.xlu1 %v2502_v53, %s2598_s4  ;;  %v2504_v56 = vpop.eup %2503 }
 0x686   :  { %v756_v58 = vadd.f32 1.0, %v2504_v56  ;;  %v2506_v59 = vpop.eup %2505 }
 0x687   :  { %v732_v60 = vadd.f32 1.0, %v2506_v59 }
 0x688   :  { %2507 = vrcp.f32 %v756_v58 }
 0x689   :  { %2509 = vrcp.f32 %v732_v60 }
 0x692   :  { %v2508_v36 = vpop.eup %2507 }
 0x693   :  { %v2510_v62 = vpop.eup %2509  ;;  %v760_v1 = vmul.f32 %v2508_v36, %v2840_v9 }
 0x694   :  { %v736_v3 = vmul.f32 %v2510_v62, %v2844_v14 }
 0x6f3   :  { %v763_v61 = vpop.permute.xlu0 %762 }
 0x6f4   :  { %v765_v57 = vmul.f32 %v2508_v36, %v763_v61 }
 0x6f6   :  { %767 = vrot.lane.b32.xlu0 %v765_v57, %s2598_s4 }
 0x6f7   :  { %v739_v63 = vpop.permute.xlu1 %738 }
 0x6f8   :  { %v741_v0 = vmul.f32 %v2510_v62, %v739_v63 }
 0x6fa   :  { %743 = vrot.lane.b32.xlu1 %v741_v0, %s2598_s4 }
 0x768   :  { %v768_v25 = vpop.permute.xlu0 %767 }
 0x769   :  { %v2880_v2 = vadd.f32 %v768_v25, %v760_v1 }
 0x76b   :  { %2511 = vtanh.f32 %v2880_v2 }
 0x76c   :  { %v744_v4 = vpop.permute.xlu1 %743 }
 0x76d   :  { %v2884_v5 = vadd.f32 %v744_v4, %v736_v3 }
 0x76f   :  { %2513 = vtanh.f32 %v2884_v5 }
 0x775   :  { %v2512_v6 = vpop.eup %2511 }
 0x776   :  { %773 = vrot.lane.b32.xlu0 %v2512_v6, %s2598_s4 }
 0x779   :  { %v2514_v7 = vpop.eup %2513 }
 0x77a   :  { %749 = vrot.lane.b32.xlu1 %v2514_v7, %s2598_s4 }
 0x7e8   :  { %v774_v8 = vpop.permute.xlu0 %773 }
 0x7e9   :  { %v2889_v9 = vmul.f32 %v2508_v36, %v774_v8 }
 0x7eb   :  { %v835_v10 = vpack.c.bf16 %v2889_v9, %v2889_v9 }
 0x7ec   :  { %v750_v13 = vpop.permute.xlu1 %749 }
 0x7ed   :  { %v2893_v16 = vmul.f32 %v2510_v62, %v750_v13  ;;  %837 = vrot.lane.b32.xlu0 %v835_v10, %s2599_s14 }
 0x7ef   :  { %v787_v14 = vpack.c.bf16 %v2893_v16, %v2893_v16 }
 0x7f1   :  { %789 = vrot.lane.b32.xlu1 %v787_v14, %s2599_s14 }
 0x85f   :  { %v838_v19 = vpop.permute.xlu0 %837 }
 0x860   :  { %2289 = vmatmul.mubr.msk.bf16.vlgmr.msra.gmra.mrb[24].mxu1 %vm323_vm2, %v838_v19 }
 0x861   :  { %2301 = vmatpush3.bf16.msra.mxu1 %v2727_v17  ;;  %2304 = vmatprep.mubr.msk.bf16.mxu1 %vm2596_vm1, %v2595_v11 }
 0x862   :  { %2302 = vmatprep.subr.bf16.mxu1 %v2595_v11 }
 0x863   :  { %v790_v20 = vpop.permute.xlu1 %789 }
 0x864   :  { %2281 = vmatmul.mubr.msk.bf16.vlgmr.msra.gmra.mrb[16].mxu0 %vm323_vm2, %v790_v20 }
 0x865   :  { %2293 = vmatpush3.bf16.msra.mxu0 %v2698_v12  ;;  %2303 = vmatpush3.bf16.msra.mxu1 %v2739_v18 }
 0x866   :  { %2294 = vmatprep.subr.bf16.mxu0 %v2595_v11  ;;  %2296 = vmatprep.mubr.msk.bf16.mxu0 %vm2596_vm1, %v2595_v11 }
 0x867   :  { %2316 = vmatprep.subr.bf16.mxu1 %v2595_v11 }
 0x869   :  { %2295 = vmatpush3.bf16.msra.mxu0 %v2714_v15 }
 0x86a   :  { %2308 = vmatprep.subr.bf16.mxu0 %v2595_v11 }
 0x933   :  { %v876_v22 = vpop.f32.mrb[24].mxu1 }
 0x934   :  { %v882_v24 = vadd.f32 %v876_v22, %v2793_v54  ;;  %v2290_v26 = vpop.f32.mrb[25].mxu1 }
 0x935   :  { %v879_v29 = vpop.f32.mrb[26].mxu1 }
 0x936   :  { %2515 = vtanh.f32 %v882_v24  ;;  %v2291_v31 = vpop.f32.mrb[27].mxu1  ;;  %v2049_v46 = vmul.f32 -1.442695, %v882_v24 }
 0x937   :  { %v828_v35 = vpop.f32.mrb[16].mxu0 }
 0x938   :  { %v834_v37 = vadd.f32 %v828_v35, %v2774_v32  ;;  %v2282_v40 = vpop.f32.mrb[17].mxu0 }
 0x939   :  { %v831_v42 = vpop.f32.mrb[18].mxu0 }
 0x93a   :  { %2517 = vtanh.f32 %v834_v37  ;;  %v2283_v43 = vpop.f32.mrb[19].mxu0  ;;  %v2048_v54 = vmul.f32 -1.442695, %v834_v37 }
 0x93b   :  { %2519 = vpow2.f32 %v2049_v46 }
 0x93c   :  { %2521 = vpow2.f32 %v2048_v54 }
 0x940   :  { %v2516_v44 = vpop.eup %2515 }
 0x941   :  { %916 = vrot.lane.b32.xlu0 %v2516_v44, %s2598_s4 }
 0x944   :  { %v2518_v45 = vpop.eup %2517 }
 0x945   :  { %892 = vrot.lane.b32.xlu1 %v2518_v45, %s2598_s4  ;;  %v2520_v48 = vpop.eup %2519 }
 0x946   :  { %v910_v49 = vadd.f32 1.0, %v2520_v48  ;;  %v2522_v51 = vpop.eup %2521 }
 0x947   :  { %v886_v53 = vadd.f32 1.0, %v2522_v51 }
 0x948   :  { %2523 = vrcp.f32 %v910_v49 }
 0x949   :  { %2525 = vrcp.f32 %v886_v53 }
 0x952   :  { %v2524_v32 = vpop.eup %2523 }
 0x953   :  { %v2526_v56 = vpop.eup %2525  ;;  %v914_v60 = vmul.f32 %v2524_v32, %v2880_v2 }
 0x954   :  { %v890_v57 = vmul.f32 %v2526_v56, %v2884_v5 }
 0x9b3   :  { %v917_v55 = vpop.permute.xlu0 %916 }
 0x9b4   :  { %v919_v52 = vmul.f32 %v2524_v32, %v917_v55 }
 0x9b6   :  { %921 = vrot.lane.b32.xlu0 %v919_v52, %s2598_s4 }
 0x9b7   :  { %v893_v58 = vpop.permute.xlu1 %892 }
 0x9b8   :  { %v895_v59 = vmul.f32 %v2526_v56, %v893_v58 }
 0x9ba   :  { %897 = vrot.lane.b32.xlu1 %v895_v59, %s2598_s4 }
 0xa28   :  { %v922_v36 = vpop.permute.xlu0 %921 }
 0xa29   :  { %v2920_v61 = vadd.f32 %v922_v36, %v914_v60 }
 0xa2b   :  { %2527 = vtanh.f32 %v2920_v61 }
 0xa2c   :  { %v898_v62 = vpop.permute.xlu1 %897 }
 0xa2d   :  { %v2924_v63 = vadd.f32 %v898_v62, %v890_v57 }
 0xa2f   :  { %2529 = vtanh.f32 %v2924_v63 }
 0xa35   :  { %v2528_v0 = vpop.eup %2527 }
 0xa36   :  { %927 = vrot.lane.b32.xlu0 %v2528_v0, %s2598_s4 }
 0xa39   :  { %v2530_v1 = vpop.eup %2529 }
 0xa3a   :  { %903 = vrot.lane.b32.xlu1 %v2530_v1, %s2598_s4 }
 0xaa8   :  { %v928_v25 = vpop.permute.xlu0 %927 }
 0xaa9   :  { %v2929_v2 = vmul.f32 %v2524_v32, %v928_v25 }
 0xaab   :  { %v989_v3 = vpack.c.bf16 %v2929_v2, %v2929_v2 }
 0xaac   :  { %v904_v4 = vpop.permute.xlu1 %903 }
 0xaad   :  { %v2933_v6 = vmul.f32 %v2526_v56, %v904_v4  ;;  %991 = vrot.lane.b32.xlu0 %v989_v3, %s2599_s14 }
 0xaaf   :  { %v941_v5 = vpack.c.bf16 %v2933_v6, %v2933_v6 }
 0xab1   :  { %943 = vrot.lane.b32.xlu1 %v941_v5, %s2599_s14 }
 0xb1f   :  { %v992_v7 = vpop.permute.xlu0 %991 }
 0xb20   :  { %2305 = vmatmul.mubr.msk.bf16.vlgmr.msra.gmra.mrb[28].mxu1 %vm323_vm2, %v992_v7 }
 0xb21   :  { %2317 = vmatpush3.bf16.msra.mxu1 %v2727_v17  ;;  %2320 = vmatprep.mubr.msk.bf16.mxu1 %vm2596_vm1, %v2595_v11 }
 0xb22   :  { %2318 = vmatprep.subr.bf16.mxu1 %v2595_v11 }
 0xb23   :  { %v944_v8 = vpop.permute.xlu1 %943 }
 0xb24   :  { %2297 = vmatmul.mubr.msk.bf16.vlgmr.msra.gmra.mrb[20].mxu0 %vm323_vm2, %v944_v8 }
 0xb25   :  { %2309 = vmatpush3.bf16.msra.mxu0 %v2698_v12  ;;  %2319 = vmatpush3.bf16.msra.mxu1 %v2739_v18 }
 0xb26   :  { %2310 = vmatprep.subr.bf16.mxu0 %v2595_v11  ;;  %2312 = vmatprep.mubr.msk.bf16.mxu0 %vm2596_vm1, %v2595_v11 }
 0xb27   :  { %2332 = vmatprep.subr.bf16.mxu1 %v2595_v11 }
 0xb29   :  { %2311 = vmatpush3.bf16.msra.mxu0 %v2714_v15 }
 0xb2a   :  { %2324 = vmatprep.subr.bf16.mxu0 %v2595_v11 }
 0xbf3   :  { %v1030_v10 = vpop.f32.mrb[28].mxu1 }
 0xbf4   :  { %v1036_v13 = vadd.f32 %v1030_v10, %v2787_v47  ;;  %v2306_v14 = vpop.f32.mrb[29].mxu1 }
 0xbf5   :  { %v1033_v19 = vpop.f32.mrb[30].mxu1 }
 0xbf6   :  { %2531 = vtanh.f32 %v1036_v13  ;;  %v2307_v20 = vpop.f32.mrb[31].mxu1  ;;  %v2053_v40 = vmul.f32 -1.442695, %v1036_v13 }
 0xbf7   :  { %v982_v22 = vpop.f32.mrb[20].mxu0 }
 0xbf8   :  { %v988_v24 = vadd.f32 %v982_v22, %v2770_v27  ;;  %v2298_v26 = vpop.f32.mrb[21].mxu0 }
 0xbf9   :  { %v985_v29 = vpop.f32.mrb[22].mxu0 }
 0xbfa   :  { %2533 = vtanh.f32 %v988_v24  ;;  %v2299_v31 = vpop.f32.mrb[23].mxu0  ;;  %v2052_v47 = vmul.f32 -1.442695, %v988_v24 }
 0xbfb   :  { %2535 = vpow2.f32 %v2053_v40 }
 0xbfc   :  { %2537 = vpow2.f32 %v2052_v47 }
 0xc00   :  { %v2532_v35 = vpop.eup %2531 }
 0xc01   :  { %1070 = vrot.lane.b32.xlu0 %v2532_v35, %s2598_s4 }
 0xc04   :  { %v2534_v37 = vpop.eup %2533 }
 0xc05   :  { %1046 = vrot.lane.b32.xlu1 %v2534_v37, %s2598_s4  ;;  %v2536_v42 = vpop.eup %2535 }
 0xc06   :  { %v1064_v43 = vadd.f32 1.0, %v2536_v42  ;;  %v2538_v44 = vpop.eup %2537 }
 0xc07   :  { %v1040_v45 = vadd.f32 1.0, %v2538_v44 }
 0xc08   :  { %2539 = vrcp.f32 %v1064_v43 }
 0xc09   :  { %2541 = vrcp.f32 %v1040_v45 }
 0xc12   :  { %v2540_v27 = vpop.eup %2539 }
 0xc13   :  { %v2542_v48 = vpop.eup %2541  ;;  %v1068_v53 = vmul.f32 %v2540_v27, %v2920_v61 }
 0xc14   :  { %v1044_v52 = vmul.f32 %v2542_v48, %v2924_v63 }
 0xc73   :  { %v1071_v46 = vpop.permute.xlu0 %1070 }
 0xc74   :  { %v1073_v54 = vmul.f32 %v2540_v27, %v1071_v46 }
 0xc76   :  { %1075 = vrot.lane.b32.xlu0 %v1073_v54, %s2598_s4 }
 0xc77   :  { %v1047_v49 = vpop.permute.xlu1 %1046 }
 0xc78   :  { %v1049_v51 = vmul.f32 %v2542_v48, %v1047_v49 }
 0xc7a   :  { %1051 = vrot.lane.b32.xlu1 %v1049_v51, %s2598_s4 }
 0xce8   :  { %v1076_v32 = vpop.permute.xlu0 %1075 }
 0xce9   :  { %v2960_v55 = vadd.f32 %v1076_v32, %v1068_v53 }
 0xceb   :  { %2543 = vtanh.f32 %v2960_v55 }
 0xcec   :  { %v1052_v56 = vpop.permute.xlu1 %1051 }
 0xced   :  { %v2964_v58 = vadd.f32 %v1052_v56, %v1044_v52 }
 0xcef   :  { %2545 = vtanh.f32 %v2964_v58 }
 0xcf5   :  { %v2544_v59 = vpop.eup %2543 }
 0xcf6   :  { %1081 = vrot.lane.b32.xlu0 %v2544_v59, %s2598_s4 }
 0xcf9   :  { %v2546_v60 = vpop.eup %2545 }
 0xcfa   :  { %1057 = vrot.lane.b32.xlu1 %v2546_v60, %s2598_s4 }
 0xd68   :  { %v1082_v36 = vpop.permute.xlu0 %1081 }
 0xd69   :  { %v2969_v61 = vmul.f32 %v2540_v27, %v1082_v36 }
 0xd6b   :  { %v1143_v57 = vpack.c.bf16 %v2969_v61, %v2969_v61 }
 0xd6c   :  { %v1058_v62 = vpop.permute.xlu1 %1057 }
 0xd6d   :  { %v2973_v0 = vmul.f32 %v2542_v48, %v1058_v62  ;;  %1145 = vrot.lane.b32.xlu0 %v1143_v57, %s2599_s14 }
 0xd6f   :  { %v1095_v63 = vpack.c.bf16 %v2973_v0, %v2973_v0 }
 0xd71   :  { %1097 = vrot.lane.b32.xlu1 %v1095_v63, %s2599_s14 }
 0xddf   :  { %v1146_v1 = vpop.permute.xlu0 %1145 }
 0xde0   :  { %2321 = vmatmul.mubr.msk.bf16.vlgmr.msra.gmra.mrb[32].mxu1 %vm323_vm2, %v1146_v1 }
 0xde1   :  { %2333 = vmatpush3.bf16.msra.mxu1 %v2727_v17  ;;  %2336 = vmatprep.mubr.msk.bf16.mxu1 %vm2596_vm1, %v2595_v11 }
 0xde2   :  { %2334 = vmatprep.subr.bf16.mxu1 %v2595_v11 }
 0xde3   :  { %v1098_v25 = vpop.permute.xlu1 %1097 }
 0xde4   :  { %2313 = vmatmul.mubr.msk.bf16.vlgmr.msra.gmra.mrb[24].mxu0 %vm323_vm2, %v1098_v25 }
 0xde5   :  { %2325 = vmatpush3.bf16.msra.mxu0 %v2698_v12  ;;  %2335 = vmatpush3.bf16.msra.mxu1 %v2739_v18 }
 0xde6   :  { %2326 = vmatprep.subr.bf16.mxu0 %v2595_v11  ;;  %2328 = vmatprep.mubr.msk.bf16.mxu0 %vm2596_vm1, %v2595_v11 }
 0xde7   :  { %2348 = vmatprep.subr.bf16.mxu1 %v2595_v11 }
 0xde9   :  { %2327 = vmatpush3.bf16.msra.mxu0 %v2714_v15 }
 0xdea   :  { %2340 = vmatprep.subr.bf16.mxu0 %v2595_v11 }
 0xeb3   :  { %v1184_v3 = vpop.f32.mrb[32].mxu1 }
 0xeb4   :  { %v1190_v4 = vadd.f32 %v1184_v3, %v2789_v50  ;;  %v2322_v5 = vpop.f32.mrb[33].mxu1 }
 0xeb5   :  { %v1187_v7 = vpop.f32.mrb[34].mxu1 }
 0xeb6   :  { %2547 = vtanh.f32 %v1190_v4  ;;  %v2323_v8 = vpop.f32.mrb[35].mxu1  ;;  %v2057_v26 = vmul.f32 -1.442695, %v1190_v4 }
 0xeb7   :  { %v1136_v10 = vpop.f32.mrb[24].mxu0 }
 0xeb8   :  { %v1142_v13 = vadd.f32 %v1136_v10, %v2766_v23  ;;  %v2314_v14 = vpop.f32.mrb[25].mxu0 }
 0xeb9   :  { %v1139_v19 = vpop.f32.mrb[26].mxu0 }
 0xeba   :  { %2549 = vtanh.f32 %v1142_v13  ;;  %v2315_v20 = vpop.f32.mrb[27].mxu0  ;;  %v2056_v50 = vmul.f32 -1.442695, %v1142_v13 }
 0xebb   :  { %2551 = vpow2.f32 %v2057_v26 }
 0xebc   :  { %2553 = vpow2.f32 %v2056_v50 }
 0xec0   :  { %v2548_v22 = vpop.eup %2547 }
 0xec1   :  { %1224 = vrot.lane.b32.xlu0 %v2548_v22, %s2598_s4 }
 0xec4   :  { %v2550_v24 = vpop.eup %2549 }
 0xec5   :  { %1200 = vrot.lane.b32.xlu1 %v2550_v24, %s2598_s4  ;;  %v2552_v29 = vpop.eup %2551 }
 0xec6   :  { %v1218_v31 = vadd.f32 1.0, %v2552_v29  ;;  %v2554_v35 = vpop.eup %2553 }
 0xec7   :  { %v1194_v37 = vadd.f32 1.0, %v2554_v35 }
 0xec8   :  { %2555 = vrcp.f32 %v1218_v31 }
 0xec9   :  { %2557 = vrcp.f32 %v1194_v37 }
 0xed2   :  { %v2556_v23 = vpop.eup %2555 }
 0xed3   :  { %v2558_v42 = vpop.eup %2557  ;;  %v1222_v45 = vmul.f32 %v2556_v23, %v2960_v55 }
 0xed4   :  { %v1198_v54 = vmul.f32 %v2558_v42, %v2964_v58 }
 0xf33   :  { %v1225_v40 = vpop.permute.xlu0 %1224 }
 0xf34   :  { %v1227_v47 = vmul.f32 %v2556_v23, %v1225_v40 }
 0xf36   :  { %1229 = vrot.lane.b32.xlu0 %v1227_v47, %s2598_s4 }
 0xf37   :  { %v1201_v43 = vpop.permute.xlu1 %1200 }
 0xf38   :  { %v1203_v44 = vmul.f32 %v2558_v42, %v1201_v43 }
 0xf3a   :  { %1205 = vrot.lane.b32.xlu1 %v1203_v44, %s2598_s4 }
 0xfa8   :  { %v1230_v27 = vpop.permute.xlu0 %1229 }
 0xfa9   :  { %v3000_v46 = vadd.f32 %v1230_v27, %v1222_v45 }
 0xfab   :  { %2559 = vtanh.f32 %v3000_v46 }
 0xfac   :  { %v1206_v48 = vpop.permute.xlu1 %1205 }
 0xfad   :  { %v3004_v49 = vadd.f32 %v1206_v48, %v1198_v54 }
 0xfaf   :  { %2561 = vtanh.f32 %v3004_v49 }
 0xfb5   :  { %v2560_v51 = vpop.eup %2559 }
 0xfb6   :  { %1235 = vrot.lane.b32.xlu0 %v2560_v51, %s2598_s4 }
 0xfb9   :  { %v2562_v53 = vpop.eup %2561 }
 0xfba   :  { %1211 = vrot.lane.b32.xlu1 %v2562_v53, %s2598_s4 }
0x1028   :  { %v1236_v32 = vpop.permute.xlu0 %1235 }
0x1029   :  { %v3009_v55 = vmul.f32 %v2556_v23, %v1236_v32 }
0x102b   :  { %v1297_v52 = vpack.c.bf16 %v3009_v55, %v3009_v55 }
0x102c   :  { %v1212_v56 = vpop.permute.xlu1 %1211 }
0x102d   :  { %v3013_v59 = vmul.f32 %v2558_v42, %v1212_v56  ;;  %1299 = vrot.lane.b32.xlu0 %v1297_v52, %s2599_s14 }
0x102f   :  { %v1249_v58 = vpack.c.bf16 %v3013_v59, %v3013_v59 }
0x1031   :  { %1251 = vrot.lane.b32.xlu1 %v1249_v58, %s2599_s14 }
0x109f   :  { %v1300_v60 = vpop.permute.xlu0 %1299 }
0x10a0   :  { %2337 = vmatmul.mubr.msk.bf16.vlgmr.msra.gmra.mrb[36].mxu1 %vm323_vm2, %v1300_v60 }
0x10a1   :  { %2349 = vmatpush3.bf16.msra.mxu1 %v2727_v17  ;;  %2352 = vmatprep.mubr.msk.bf16.mxu1 %vm2596_vm1, %v2595_v11 }
0x10a2   :  { %2350 = vmatprep.subr.bf16.mxu1 %v2595_v11 }
0x10a3   :  { %v1252_v36 = vpop.permute.xlu1 %1251 }
0x10a4   :  { %2329 = vmatmul.mubr.msk.bf16.vlgmr.msra.gmra.mrb[28].mxu0 %vm323_vm2, %v1252_v36 }
0x10a5   :  { %2341 = vmatpush3.bf16.msra.mxu0 %v2698_v12  ;;  %2351 = vmatpush3.bf16.msra.mxu1 %v2739_v18 }
0x10a6   :  { %2342 = vmatprep.subr.bf16.mxu0 %v2595_v11  ;;  %2344 = vmatprep.mubr.msk.bf16.mxu0 %vm2596_vm1, %v2595_v11 }
0x10a9   :  { %2343 = vmatpush3.bf16.msra.mxu0 %v2714_v15 }
0x1173   :  { %v1338_v17 = vpop.f32.mrb[36].mxu1 }
0x1174   :  { %v1344_v57 = vadd.f32 %v1338_v17, %v2783_v39  ;;  %v2338_v62 = vpop.f32.mrb[37].mxu1 }
0x1175   :  { %v1341_v63 = vpop.f32.mrb[38].mxu1 }
0x1176   :  { %2563 = vtanh.f32 %v1344_v57  ;;  %v2339_v1 = vpop.f32.mrb[39].mxu1  ;;  %v2061_v15 = vmul.f32 -1.442695, %v1344_v57 }
0x1177   :  { %v1290_v25 = vpop.f32.mrb[28].mxu0 }
0x1178   :  { %v1296_v3 = vadd.f32 %v1290_v25, %v2776_v34  ;;  %v2330_v12 = vpop.f32.mrb[29].mxu0 }
0x1179   :  { %v1293_v4 = vpop.f32.mrb[30].mxu0 }
0x117a   :  { %2565 = vtanh.f32 %v1296_v3  ;;  %v2331_v18 = vpop.f32.mrb[31].mxu0  ;;  %v2060_v39 = vmul.f32 -1.442695, %v1296_v3 }
0x117b   :  { %2567 = vpow2.f32 %v2061_v15 }
0x117c   :  { %2569 = vpow2.f32 %v2060_v39 }
0x1180   :  { %v2564_v5 = vpop.eup %2563 }
0x1181   :  { %1378 = vrot.lane.b32.xlu0 %v2564_v5, %s2598_s4 }
0x1184   :  { %v2566_v11 = vpop.eup %2565 }
0x1185   :  { %1354 = vrot.lane.b32.xlu1 %v2566_v11, %s2598_s4  ;;  %v2568_v7 = vpop.eup %2567 }
0x1186   :  { %v1372_v8 = vadd.f32 1.0, %v2568_v7  ;;  %v2570_v10 = vpop.eup %2569 }
0x1187   :  { %v1348_v13 = vadd.f32 1.0, %v2570_v10 }
0x1188   :  { %2571 = vrcp.f32 %v1372_v8 }
0x1189   :  { %2573 = vrcp.f32 %v1348_v13 }
0x1192   :  { %v2572_v34 = vpop.eup %2571 }
0x1193   :  { %v2574_v20 = vpop.eup %2573  ;;  %v1376_v26 = vmul.f32 %v2572_v34, %v3000_v46 }
0x1194   :  { %v1352_v31 = vmul.f32 %v2574_v20, %v3004_v49 }
0x11f3   :  { %v1379_v14 = vpop.permute.xlu0 %1378 }
0x11f4   :  { %v1381_v19 = vmul.f32 %v2572_v34, %v1379_v14 }
0x11f6   :  { %1383 = vrot.lane.b32.xlu0 %v1381_v19, %s2598_s4  ;;  %v1577_v19 = vld [vmem:[%s3199_s8] sm:$0xff] }
0x11f7   :  { %v1355_v22 = vpop.permute.xlu1 %1354 }
0x11f8   :  { %v1357_v24 = vmul.f32 %v2574_v20, %v1355_v22  ;;  %v1566_v22 = vld [vmem:[%s3200_s7 + $0x8] sm:$0xff] }
0x11fa   :  { %1359 = vrot.lane.b32.xlu1 %v1357_v24, %s2598_s4 }
0x1268   :  { %v1384_v50 = vpop.permute.xlu0 %1383 }
0x1269   :  { %v1386_v29 = vadd.f32 %v1384_v50, %v1376_v26 }
0x126b   :  { %2575 = vtanh.f32 %v1386_v29 }
0x126c   :  { %v1360_v35 = vpop.permute.xlu1 %1359 }
0x126d   :  { %v1362_v37 = vadd.f32 %v1360_v35, %v1352_v31 }
0x126f   :  { %2577 = vtanh.f32 %v1362_v37 }
0x1275   :  { %v2576_v23 = vpop.eup %2575 }
0x1276   :  { %1389 = vrot.lane.b32.xlu0 %v2576_v23, %s2598_s4 }
0x1279   :  { %v2578_v40 = vpop.eup %2577 }
0x127a   :  { %1365 = vrot.lane.b32.xlu1 %v2578_v40, %s2598_s4 }
0x12e8   :  { %v1390_v47 = vpop.permute.xlu0 %1389 }
0x12e9   :  { %v1392_v42 = vmul.f32 %v2572_v34, %v1390_v47 }
0x12eb   :  { %v1451_v43 = vpack.c.bf16 %v1392_v42, %v1392_v42 }
0x12ec   :  { %v1366_v44 = vpop.permute.xlu1 %1365 }
0x12ed   :  { %v3041_v45 = vmul.f32 %v2574_v20, %v1366_v44  ;;  %1453 = vrot.lane.b32.xlu0 %v1451_v43, %s2599_s14  ;;  %v1565_v20 = vld [vmem:[%s3200_s7] sm:$0xff]  ;;  %v1567_v43 = vld [vmem:[%s3200_s7 + $0x10] sm:$0xff]  ;;  %v1568_v44 = vld [vmem:[%s3200_s7 + $0x18] sm:$0xff] }
0x12ee   :  { %v2432_v26 = vpack.c.bf16 %v1566_v22, %v1565_v20 }
0x12ef   :  { %v1403_v27 = vpack.c.bf16 %v3041_v45, %v3041_v45 }
0x12f1   :  { %1405 = vrot.lane.b32.xlu1 %v1403_v27, %s2599_s14 }
0x135f   :  { %v1454_v46 = vpop.permute.xlu0 %1453 }
0x1360   :  { %2353 = vmatmul.mubr.msk.bf16.vlgmr.msra.gmra.mrb[40].mxu1 %vm323_vm2, %v1454_v46  ;;  %v2436_v46 = vpack.c.bf16 %v1568_v44, %v1567_v43 }
0x1363   :  { %v1406_v54 = vpop.permute.xlu1 %1405 }
0x1364   :  { %2345 = vmatmul.mubr.msk.bf16.vlgmr.msra.gmra.mrb[32].mxu0 %vm323_vm2, %v1406_v54 }
0x1433   :  { %v1492_v48 = vpop.f32.mrb[40].mxu1 }
0x1434   :  { %v1498_v49 = vadd.f32 %v1492_v48, %v2785_v41  ;;  %v2354_v51 = vpop.f32.mrb[41].mxu1 }
0x1435   :  { %v1495_v53 = vpop.f32.mrb[42].mxu1 }
0x1436   :  { %2579 = vtanh.f32 %v1498_v49  ;;  %v2355_v32 = vpop.f32.mrb[43].mxu1  ;;  %v2065_v62 = vmul.f32 -1.442695, %v1498_v49 }
0x1437   :  { %v1444_v52 = vpop.f32.mrb[32].mxu0 }
0x1438   :  { %v1450_v56 = vadd.f32 %v1444_v52, %v2772_v30  ;;  %v2346_v58 = vpop.f32.mrb[33].mxu0 }
0x1439   :  { %v1447_v60 = vpop.f32.mrb[34].mxu0 }
0x143a   :  { %2581 = vtanh.f32 %v1450_v56  ;;  %v2347_v36 = vpop.f32.mrb[35].mxu0  ;;  %v2064_v41 = vmul.f32 -1.442695, %v1450_v56 }
0x143b   :  { %2583 = vpow2.f32 %v2065_v62 }
0x143c   :  { %2585 = vpow2.f32 %v2064_v41 }
0x1440   :  { %v2580_v17 = vpop.eup %2579 }
0x1441   :  { %1532 = vrot.lane.b32.xlu0 %v2580_v17, %s2598_s4 }
0x1444   :  { %v2582_v57 = vpop.eup %2581 }
0x1445   :  { %1508 = vrot.lane.b32.xlu1 %v2582_v57, %s2598_s4  ;;  %v2584_v63 = vpop.eup %2583 }
0x1446   :  { %v1526_v1 = vadd.f32 1.0, %v2584_v63  ;;  %v2586_v25 = vpop.eup %2585 }
0x1447   :  { %v1502_v3 = vadd.f32 1.0, %v2586_v25 }
0x1448   :  { %2587 = vrcp.f32 %v1526_v1 }
0x1449   :  { %2589 = vrcp.f32 %v1502_v3 }
0x1452   :  { %v2588_v30 = vpop.eup %2587 }
0x1453   :  { %v2590_v18 = vpop.eup %2589  ;;  %v1530_v15 = vmul.f32 %v2588_v30, %v1386_v29 }
0x1454   :  { %v1506_v8 = vmul.f32 %v2590_v18, %v1362_v37 }
0x14b3   :  { %v1533_v12 = vpop.permute.xlu0 %1532 }
0x14b4   :  { %v1535_v4 = vmul.f32 %v2588_v30, %v1533_v12  ;;  %v1864_v12 = vld [vmem:[%s3201_s10 + $0x10] sm:$0xff] }
0x14b6   :  { %1537 = vrot.lane.b32.xlu0 %v1535_v4, %s2598_s4  ;;  %v1865_v4 = vld [vmem:[%s3201_s10 + $0x18] sm:$0xff] }
0x14b7   :  { %v1509_v5 = vpop.permute.xlu1 %1508 }
0x14b8   :  { %v1511_v11 = vmul.f32 %v2590_v18, %v1509_v5  ;;  %v2082_v5 = vld [vmem:[%s3202_s9] ss:$0 sm:$0xff] }
0x14ba   :  { %1513 = vrot.lane.b32.xlu1 %v1511_v11, %s2598_s4 }
0x1528   :  { %v1538_v39 = vpop.permute.xlu0 %1537 }
0x1529   :  { %v1540_v7 = vadd.f32 %v1538_v39, %v1530_v15 }
0x152b   :  { %2591 = vtanh.f32 %v1540_v7 }
0x152c   :  { %v1514_v10 = vpop.permute.xlu1 %1513 }
0x152d   :  { %v1516_v13 = vadd.f32 %v1514_v10, %v1506_v8 }
0x152f   :  { %2593 = vtanh.f32 %v1516_v13 }
0x1535   :  { %v2592_v34 = vpop.eup %2591 }
0x1536   :  { %1543 = vrot.lane.b32.xlu0 %v2592_v34, %s2598_s4 }
0x1539   :  { %v2594_v14 = vpop.eup %2593 }
0x153a   :  { %1519 = vrot.lane.b32.xlu1 %v2594_v14, %s2598_s4 }
0x153e   :  { %1399 = vrot.lane.b32.xlu1 %v1392_v42, %s2599_s14 }
0x1542   :  { %1091 = vrot.lane.b32.xlu1 %v2969_v61, %s2599_s14 }
0x1546   :  { %783 = vrot.lane.b32.xlu1 %v2889_v9, %s2599_s14  ;;  %v1578_v9 = vld [vmem:[%s3199_s8 + $0x8] sm:$0xff] }
0x1547   :  { %v2424_v61 = vpack.c.bf16 %v1578_v9, %v1577_v19 }
0x1549   :  { %2425 = vmatprep.subr.bf16.mxu0 %v2424_v61 }
0x154a   :  { %475 = vrot.lane.b32.xlu1 %v2809_v33, %s2599_s14  ;;  %2427 = vmatpush3.bf16.msra.mxu0 %v2424_v61  ;;  %v1579_v33 = vld [vmem:[%s3199_s8 + $0x10] sm:$0xff] }
0x154e   :  { %624 = vrot.lane.b32.xlu1 %v2853_v28, %s2599_s14  ;;  %v1580_v28 = vld [vmem:[%s3199_s8 + $0x18] sm:$0xff] }
0x1552   :  { %932 = vrot.lane.b32.xlu1 %v2933_v6, %s2599_s14  ;;  %v2428_v6 = vpack.c.bf16 %v1580_v28, %v1579_v33 }
0x1554   :  { %2429 = vmatprep.subr.bf16.mxu0 %v2428_v6 }
0x1555   :  { %2431 = vmatpush3.bf16.msra.mxu0 %v2428_v6 }
0x1556   :  { %1240 = vrot.lane.b32.xlu1 %v3013_v59, %s2599_s14  ;;  %2433 = vmatprep.subr.bf16.mxu0 %v2432_v26 }
0x15a8   :  { %v1544_v59 = vpop.permute.xlu0 %1543 }
0x15a9   :  { %v1546_v24 = vmul.f32 %v2588_v30, %v1544_v59 }
0x15ab   :  { %1553 = vrot.lane.b32.xlu0 %v1546_v24, %s2599_s14 }
0x15ac   :  { %v1520_v50 = vpop.permute.xlu1 %1519 }
0x15ad   :  { %v1522_v29 = vmul.f32 %v2590_v18, %v1520_v50  ;;  %v2444_v18 = vpack.c.bf16 %v1865_v4, %v1864_v12 }
0x15af   :  { %1245 = vrot.lane.b32.xlu0 %v3009_v55, %s2599_s14  ;;  %1548 = vrot.lane.b32.xlu1 %v1522_v29, %s2599_s14 }
0x15b0   :  { %v1400_v31 = vpop.permute.xlu1 %1399 }
0x15b1   :  { %1402 = vst.msk [vmem:[#allocation3 + $0x8] sm:$0xff] %vm323_vm2, %v1400_v31 }
0x15b3   :  { %937 = vrot.lane.b32.xlu0 %v2929_v2, %s2599_s14 }
0x15b4   :  { %v1092_v35 = vpop.permute.xlu1 %1091 }
0x15b5   :  { %1094 = vst.msk [vmem:[#allocation3 + $0x18] sm:$0xff] %vm323_vm2, %v1092_v35 }
0x15b7   :  { %629 = vrot.lane.b32.xlu0 %v2849_v21, %s2599_s14  ;;  %v1862_v21 = vld [vmem:[%s3201_s10] sm:$0xff] }
0x15b8   :  { %v784_v37 = vpop.permute.xlu1 %783  ;;  %v1570_v54 = vld [vmem:[#allocation3 + $0x8] sm:$0xff] }
0x15b9   :  { %786 = vst.msk [vmem:[#allocation3 + $0x28] sm:$0xff] %vm323_vm2, %v784_v37  ;;  %v2083_v37 = vld [vmem:[%s3203_s11] ss:$0 sm:$0xff] }
0x15bb   :  { %470 = vrot.lane.b32.xlu0 %v2813_v38, %s2599_s14  ;;  %v1863_v38 = vld [vmem:[%s3201_s10 + $0x8] sm:$0xff] }
0x15bc   :  { %v476_v55 = vpop.permute.xlu1 %475  ;;  %v2440_v40 = vpack.c.bf16 %v1863_v38, %v1862_v21  ;;  %v1572_v51 = vld [vmem:[#allocation3 + $0x18] sm:$0xff] }
0x15bd   :  { %478 = vst.msk [vmem:[#allocation3 + $0x38] sm:$0xff] %vm323_vm2, %v476_v55 }
0x15be   :  { %2441 = vmatprep.subr.bf16.mxu1 %v2440_v40 }
0x15bf   :  { %778 = vrot.lane.b32.xlu0 %v2893_v16, %s2599_s14  ;;  %2443 = vmatpush3.bf16.msra.mxu1 %v2440_v40 }
0x15c0   :  { %v625_v23 = vpop.permute.xlu1 %624  ;;  %v1574_v52 = vld [vmem:[#allocation3 + $0x28] sm:$0xff]  ;;  %2445 = vmatprep.subr.bf16.mxu1 %v2444_v18 }
0x15c1   :  { %627 = vst.msk [vmem:[#allocation2 + $0x8] sm:$0xff] %vm323_vm2, %v625_v23 }
0x15c3   :  { %1086 = vrot.lane.b32.xlu0 %v2973_v0, %s2599_s14  ;;  %2447 = vmatpush3.bf16.msra.mxu1 %v2444_v18 }
0x15c4   :  { %v933_v2 = vpop.permute.xlu1 %932  ;;  %v1576_v60 = vld [vmem:[#allocation3 + $0x38] sm:$0xff] }
0x15c5   :  { %935 = vst.msk [vmem:[#allocation2 + $0x18] sm:$0xff] %vm323_vm2, %v933_v2 }
0x15c7   :  { %1394 = vrot.lane.b32.xlu0 %v3041_v45, %s2599_s14 }
0x15c8   :  { %v1241_v16 = vpop.permute.xlu1 %1240  ;;  %v1558_v57 = vld [vmem:[#allocation2 + $0x8] sm:$0xff] }
0x15c9   :  { %1243 = vst.msk [vmem:[#allocation2 + $0x28] sm:$0xff] %vm323_vm2, %v1241_v16 }
0x15cc   :  { %v1560_v63 = vld [vmem:[#allocation2 + $0x18] sm:$0xff] }
0x15d0   :  { %v1562_v25 = vld [vmem:[#allocation2 + $0x28] sm:$0xff] }
0x161d   :  { %v1554_v0 = vpop.permute.xlu0 %1553 }
0x161e   :  { %1556 = vst.msk [vmem:[#allocation3] sm:$0xff] %vm323_vm2, %v1554_v0 }
0x1621   :  { %v1246_v47 = vpop.permute.xlu0 %1245  ;;  %v1549_v42 = vpop.permute.xlu1 %1548 }
0x1622   :  { %1248 = vst.msk [vmem:[#allocation3 + $0x10] sm:$0xff] %vm323_vm2, %v1246_v47  ;;  %1551 = vst.msk [vmem:[#allocation2 + $0x38] sm:$0xff] %vm323_vm2, %v1549_v42 }
0x1625   :  { %v938_v45 = vpop.permute.xlu0 %937  ;;  %v1569_v27 = vld [vmem:[#allocation3] sm:$0xff] }
0x1626   :  { %940 = vst.msk [vmem:[#allocation3 + $0x20] sm:$0xff] %vm323_vm2, %v938_v45  ;;  %2364 = vmatprep.mubr.msk.f32.mxu0 %vm323_vm2, %v1569_v27 }
0x1627   :  { %2365 = vmatmul.mubr.msk.f32.vlgmr.msra.gmra.mrb[36].mxu0 %vm323_vm2, %v1570_v54 }
0x1628   :  { %2435 = vmatpush3.bf16.msra.mxu0 %v2432_v26 }
0x1629   :  { %v630_v48 = vpop.permute.xlu0 %629  ;;  %v1571_v49 = vld [vmem:[#allocation3 + $0x10] sm:$0xff]  ;;  %2437 = vmatprep.subr.bf16.mxu0 %v2436_v46  ;;  %v1564_v30 = vld [vmem:[#allocation2 + $0x38] sm:$0xff] }
0x162a   :  { %632 = vst.msk [vmem:[#allocation3 + $0x30] sm:$0xff] %vm323_vm2, %v630_v48  ;;  %2367 = vmatprep.mubr.msk.f32.mxu0 %vm323_vm2, %v1571_v49 }
0x162b   :  { %2368 = vmatmul.mubr.msk.f32.gmra.mrb[38].mxu0 %vm323_vm2, %v1572_v51 }
0x162c   :  { %2439 = vmatpush3.bf16.msra.mxu0 %v2436_v46 }
0x162d   :  { %v471_v53 = vpop.permute.xlu0 %470  ;;  %v1573_v32 = vld [vmem:[#allocation3 + $0x20] sm:$0xff] }
0x162e   :  { %473 = vst.msk [vmem:[#allocation2] sm:$0xff] %vm323_vm2, %v471_v53  ;;  %2370 = vmatprep.mubr.msk.f32.mxu0 %vm323_vm2, %v1573_v32 }
0x162f   :  { %2371 = vmatmul.mubr.msk.f32.gmra.mrb[40].mxu0 %vm323_vm2, %v1574_v52 }
0x1631   :  { %v779_v56 = vpop.permute.xlu0 %778  ;;  %v1575_v58 = vld [vmem:[#allocation3 + $0x30] sm:$0xff] }
0x1632   :  { %781 = vst.msk [vmem:[#allocation2 + $0x10] sm:$0xff] %vm323_vm2, %v779_v56  ;;  %2373 = vmatprep.mubr.msk.f32.mxu0 %vm323_vm2, %v1575_v58 }
0x1633   :  { %2374 = vmatmul.mubr.msk.f32.gmra.mrb[42].mxu0 %vm323_vm2, %v1576_v60 }
0x1635   :  { %v1087_v36 = vpop.permute.xlu0 %1086  ;;  %v1557_v17 = vld [vmem:[#allocation2] sm:$0xff] }
0x1636   :  { %1089 = vst.msk [vmem:[#allocation2 + $0x20] sm:$0xff] %vm323_vm2, %v1087_v36  ;;  %2384 = vmatprep.mubr.msk.f32.mxu0 %vm323_vm2, %v1557_v17 }
0x1637   :  { %2385 = vmatmul.mubr.msk.f32.vlgmr.msra.gmra.mrb[36].mxu0 %vm323_vm2, %v1558_v57 }
0x1639   :  { %v1395_v62 = vpop.permute.xlu0 %1394  ;;  %v1559_v41 = vld [vmem:[#allocation2 + $0x10] sm:$0xff] }
0x163a   :  { %1397 = vst.msk [vmem:[#allocation2 + $0x30] sm:$0xff] %vm323_vm2, %v1395_v62  ;;  %2387 = vmatprep.mubr.msk.f32.mxu0 %vm323_vm2, %v1559_v41 }
0x163b   :  { %2388 = vmatmul.mubr.msk.f32.gmra.mrb[38].mxu0 %vm323_vm2, %v1560_v63 }
0x163d   :  { %v1561_v1 = vld [vmem:[#allocation2 + $0x20] sm:$0xff] }
0x163e   :  { %2390 = vmatprep.mubr.msk.f32.mxu0 %vm323_vm2, %v1561_v1 }
0x163f   :  { %2391 = vmatmul.mubr.msk.f32.gmra.mrb[40].mxu0 %vm323_vm2, %v1562_v25 }
0x1641   :  { %v1563_v3 = vld [vmem:[#allocation2 + $0x30] sm:$0xff] }
0x1642   :  { %2393 = vmatprep.mubr.msk.f32.mxu0 %vm323_vm2, %v1563_v3 }
0x1643   :  { %2394 = vmatmul.mubr.msk.f32.gmra.mrb[42].mxu0 %vm323_vm2, %v1564_v30 }
0x170a   :  { %v2386_v11 = vpop.f32.mrb[36].mxu0 }
0x170b   :  { %v1847_v15 = vadd.f32 %v2386_v11, %v2082_v5  ;;  %v1800_v39 = vpop.f32.mrb[37].mxu0 }
0x170c   :  { %v1846_v7 = vadd.f32 %v2082_v5, %v1800_v39 }
0x170d   :  { %v1855_v13 = vmax.f32 %v1847_v15, 0.0 }
0x170e   :  { %v1854_v8 = vmax.f32 %v1846_v7, 0.0  ;;  %v2389_v10 = vpop.f32.mrb[38].mxu0 }
0x170f   :  { %v1849_v34 = vadd.f32 %v2389_v10, %v2082_v5  ;;  %v1810_v14 = vpop.f32.mrb[39].mxu0 }
0x1710   :  { %v1848_v19 = vadd.f32 %v2082_v5, %v1810_v14  ;;  %2404 = vmatprep.mubr.msk.f32.mxu1 %vm323_vm2, %v1854_v8 }
0x1711   :  { %2405 = vmatmul.mubr.msk.f32.vlgmr.msra.gmra.mrb[44].mxu1 %vm323_vm2, %v1855_v13  ;;  %v1857_v33 = vmax.f32 %v1849_v34, 0.0 }
0x1712   :  { %v1856_v9 = vmax.f32 %v1848_v19, 0.0  ;;  %v2392_v61 = vpop.f32.mrb[40].mxu0 }
0x1713   :  { %v1851_v28 = vadd.f32 %v2392_v61, %v2082_v5  ;;  %v1820_v6 = vpop.f32.mrb[41].mxu0 }
0x1714   :  { %v1850_v59 = vadd.f32 %v2082_v5, %v1820_v6  ;;  %2407 = vmatprep.mubr.msk.f32.mxu1 %vm323_vm2, %v1856_v9 }
0x1715   :  { %2408 = vmatmul.mubr.msk.f32.gmra.mrb[46].mxu1 %vm323_vm2, %v1857_v33  ;;  %v1859_v24 = vmax.f32 %v1851_v28, 0.0 }
0x1716   :  { %v1858_v20 = vmax.f32 %v1850_v59, 0.0  ;;  %v2395_v22 = vpop.f32.mrb[42].mxu0 }
0x1717   :  { %v1853_v26 = vadd.f32 %v2395_v22, %v2082_v5  ;;  %v1830_v50 = vpop.f32.mrb[43].mxu0 }
0x1718   :  { %v1852_v29 = vadd.f32 %v2082_v5, %v1830_v50  ;;  %2410 = vmatprep.mubr.msk.f32.mxu1 %vm323_vm2, %v1858_v20 }
0x1719   :  { %2411 = vmatmul.mubr.msk.f32.gmra.mrb[48].mxu1 %vm323_vm2, %v1859_v24  ;;  %v1861_v35 = vmax.f32 %v1853_v26, 0.0 }
0x171a   :  { %v1860_v31 = vmax.f32 %v1852_v29, 0.0 }
0x171c   :  { %2413 = vmatprep.mubr.msk.f32.mxu1 %vm323_vm2, %v1860_v31 }
0x171d   :  { %2414 = vmatmul.mubr.msk.f32.gmra.mrb[50].mxu1 %vm323_vm2, %v1861_v35 }
0x17e4   :  { %v2406_v55 = vpop.f32.mrb[44].mxu1 }
0x17e5   :  { %v1969_v23 = vadd.f32 %v2406_v55, %v2083_v37  ;;  %v1963_v2 = vpop.f32.mrb[45].mxu1 }
0x17e6   :  { %v1964_v21 = vadd.f32 %v2083_v37, %v1963_v2 }
0x17e7   :  { %2003 = vst [vmem:[%s3204_s12 + $0x8] sm:$0xff] %v1969_v23 }
0x17e8   :  { %2002 = vst [vmem:[%s3204_s12] sm:$0xff] %v1964_v21  ;;  %v2409_v38 = vpop.f32.mrb[46].mxu1 }
0x17e9   :  { %v1979_v40 = vadd.f32 %v2409_v38, %v2083_v37  ;;  %v1973_v16 = vpop.f32.mrb[47].mxu1 }
0x17ea   :  { %v1974_v0 = vadd.f32 %v2083_v37, %v1973_v16 }
0x17eb   :  { %2005 = vst [vmem:[%s3204_s12 + $0x18] sm:$0xff] %v1979_v40 }
0x17ec   :  { %2004 = vst [vmem:[%s3204_s12 + $0x10] sm:$0xff] %v1974_v0  ;;  %v2412_v47 = vpop.f32.mrb[48].mxu1 }
0x17ed   :  { %v1989_v42 = vadd.f32 %v2412_v47, %v2083_v37  ;;  %v1983_v43 = vpop.f32.mrb[49].mxu1 }
0x17ee   :  { %v1984_v44 = vadd.f32 %v2083_v37, %v1983_v43 }
0x17ef   :  { %2007 = vst [vmem:[%s3204_s12 + $0x28] sm:$0xff] %v1989_v42 }
0x17f0   :  { %2006 = vst [vmem:[%s3204_s12 + $0x20] sm:$0xff] %v1984_v44  ;;  %v2415_v45 = vpop.f32.mrb[50].mxu1 }
0x17f1   :  { %v1999_v27 = vadd.f32 %v2415_v45, %v2083_v37  ;;  %v1993_v46 = vpop.f32.mrb[51].mxu1 }
0x17f2   :  { %v1994_v54 = vadd.f32 %v2083_v37, %v1993_v46 }
0x17f3   :  { %2009 = vst [vmem:[%s3204_s12 + $0x38] sm:$0xff] %v1999_v27 }
0x17f4   :  { %2008 = vst [vmem:[%s3204_s12 + $0x30] sm:$0xff] %v1994_v54 }

</bundles_post_ra>
